<compile_context>
chip_gen: v7x
topology: tpu7x:2x2x1
jax: 0.10.0
libtpu: 0.0.40
codegen_flags: <defaults>
</compile_context>

<pallas_src>
import jax
import jax.numpy as jnp
from jax import lax
from jax.experimental import pallas as pl
from jax.experimental.pallas import tpu as pltpu

# ----- small, self-consistent hyperparameters (module structure preserved) ---
VOCAB = 64            # vocab_size = len(chars)  (synthetic)
VOCAB_PAD = 128       # vocab padded to a full 128-lane vreg for the HBM store
N_EMBD = 32           # n_embd
N_HEAD = 4            # n_head
HEAD_SIZE = N_EMBD // N_HEAD
N_LAYER = 2           # n_layer
BLOCK_SIZE = 16       # block_size (max context)
EPS = 1e-5            # nn.LayerNorm default eps
NEG_BIG = -1e30       # additive causal-mask value


def _layernorm(x, g, b):
    # Two INDEPENDENT cross-lane reductions; var = E[x^2] - E[x]^2.
    mu = jnp.mean(x, axis=-1, keepdims=True)
    ms = jnp.mean(x * x, axis=-1, keepdims=True)
    var = ms - mu * mu
    return (x - mu) * lax.rsqrt(var + EPS) * g + b


# ------------------------- fully fused forward kernel ------------------------
def gpt_forward_kernel(idx_ref, tok_ref, pos_ref,
                       ln1g_ref, ln1b_ref, wqkv_ref,
                       wproj_ref, bproj_ref, ln2g_ref, ln2b_ref,
                       w1_ref, b1_ref, w2_ref, b2_ref,
                       lnfg_ref, lnfb_ref, wlm_ref, blm_ref, o_ref):
    T, E = pos_ref.shape
    BT = idx_ref.shape[0]
    B = BT // T
    H, D = N_HEAD, HEAD_SIZE

    # --- fused embedding lookup: one-hot matmul gather (MXU) + pos add ------
    ids = idx_ref[...]                                            # (BT, 1) i32
    vocab_iota = lax.broadcasted_iota(jnp.int32, (BT, VOCAB), 1)
    onehot = (vocab_iota == ids).astype(jnp.float32)              # (BT, VOCAB)
    x = jnp.dot(onehot, tok_ref[...], preferred_element_type=jnp.float32)
    x = x + jnp.tile(pos_ref[...], (B, 1))                        # (BT, E)

    # --- additive causal mask (0 / -1e30), built ONCE, reused everywhere ----
    row = lax.broadcasted_iota(jnp.int32, (T, T), 0)
    col = lax.broadcasted_iota(jnp.int32, (T, T), 1)
    mask = jnp.where(col <= row, 0.0, NEG_BIG)[None]              # (1, T, T)

    for l in range(N_LAYER):                 # static unroll, weights in VMEM
        # ---------------- x = x + MHA(LN1(x)) ----------------
        xn = _layernorm(x, ln1g_ref[l], ln1b_ref[l])              # (BT, E)
        # Fused QKV matmul: one MXU push per layer.  Scale C**-0.5 is already
        # folded into the q columns of wqkv at parameter-prep time.
        qkv = jnp.dot(xn, wqkv_ref[l], preferred_element_type=jnp.float32)

        # Head batching: static lane slices -> (H*B, T, D) stacks (leading-axis
        # concat only; no lane<->sublane transposes).
        def split_heads(off):
            return jnp.concatenate(
                [qkv[:, off + h * D: off + (h + 1) * D].reshape(B, T, D)
                 for h in range(H)], axis=0)                      # (H*B, T, D)

        q = split_heads(0)
        k = split_heads(E)
        v = split_heads(2 * E)

        s = jnp.einsum('bqd,bkd->bqk', q, k,
                       preferred_element_type=jnp.float32) + mask  # (HB, T, T)
        s = s - jnp.max(s, axis=-1, keepdims=True)
        p = jnp.exp(s)
        p = p * pl.reciprocal(jnp.sum(p, axis=-1, keepdims=True), approx=True)
        # dropout(attention weights) -> identity in eval mode
        o = jnp.einsum('bqk,bkd->bqd', p, v,
                       preferred_element_type=jnp.float32)          # (HB, T, D)

        # Re-assemble heads along lanes and apply proj as ONE (E,E) matmul.
        o = o.reshape(H, BT, D)
        cat = jnp.concatenate([o[h] for h in range(H)], axis=-1)    # (BT, E)
        x = x + jnp.dot(cat, wproj_ref[l],
                        preferred_element_type=jnp.float32) + bproj_ref[l]
        # residual (+ proj bias); dropout = identity

        # ---------------- x = x + FFN(LN2(x)) ----------------
        xn2 = _layernorm(x, ln2g_ref[l], ln2b_ref[l])
        h1 = jnp.dot(xn2, w1_ref[l], preferred_element_type=jnp.float32) + b1_ref[l]
        h1 = jnp.maximum(h1, 0.0)
        x = x + jnp.dot(h1, w2_ref[l], preferred_element_type=jnp.float32) + b2_ref[l]

    # ------------- final LayerNorm + lm_head (lane-dense, vocab padded) ------
    xf = _layernorm(x, lnfg_ref[...], lnfb_ref[...])
    o_ref[...] = jnp.dot(xf, wlm_ref[...],
                         preferred_element_type=jnp.float32) + blm_ref[...]


# -------------------- parameter re-packing for the kernel --------------------
def prepare_kernel_params(params):
    """Re-pack module parameters into kernel-friendly stacked layouts.

    Call ONCE (outside the jitted forward) and reuse the packed pytree — the
    repack ops must not re-execute on every forward call.
    """
    layers = params["layers"]
    # NOTE: the reference scales attention by C**-0.5 with C = n_embd (input
    # dim of Head, Karpathy-style) -- NOT HEAD_SIZE**-0.5.  Folded into wq.
    scale = float(N_EMBD) ** -0.5
    stack = lambda name: jnp.stack([lp[name] for lp in layers])
    wqkv = jnp.stack([jnp.concatenate([lp["wq"] * scale, lp["wk"], lp["wv"]],
                                      axis=1) for lp in layers])   # (L, E, 3E)
    return {
        "tok_emb": params["tok_emb"],                              # (V, E)
        "pos_emb": params["pos_emb"],                              # (BLOCK, E)
        "ln1_g": stack("ln1_g"), "ln1_b": stack("ln1_b"),          # (L, 1, E)
        "wqkv": wqkv,                                              # (L, E, 3E)
        "wproj": stack("wproj"),                                   # (L, E, E)
        "bproj": stack("bproj"),                                   # (L, 1, E)
        "ln2_g": stack("ln2_g"), "ln2_b": stack("ln2_b"),
        "w1": stack("w1"), "b1": stack("b1"),                      # (L,E,4E),(L,1,4E)
        "w2": stack("w2"), "b2": stack("b2"),                      # (L,4E,E),(L,1,E)
        "lnf_g": params["lnf_g"], "lnf_b": params["lnf_b"],        # (1, E)
        "w_lm": jnp.pad(params["w_lm"], ((0, 0), (0, VOCAB_PAD - VOCAB))),  # (E,128)
        "b_lm": jnp.pad(params["b_lm"], ((0, 0), (0, VOCAB_PAD - VOCAB))),  # (1,128)
    }


@jax.jit
def bigram_forward(index, kp):
    """Forward pass: returns logits (B, T, VOCAB); loss=None (targets=None).

    `kp` is the pre-packed pytree from prepare_kernel_params (hoisted out of
    the per-call path).
    """
    B, T = index.shape
    idx = index.reshape(B * T, 1).astype(jnp.int32)
    pos = kp["pos_emb"][:T]                                        # (T, E)

    args = (idx, kp["tok_emb"], pos,
            kp["ln1_g"], kp["ln1_b"], kp["wqkv"],
            kp["wproj"], kp["bproj"], kp["ln2_g"], kp["ln2_b"],
            kp["w1"], kp["b1"], kp["w2"], kp["b2"],
            kp["lnf_g"], kp["lnf_b"], kp["w_lm"], kp["b_lm"])

    logits_pad = pl.pallas_call(
        gpt_forward_kernel,
        # single grid step: whole arrays VMEM-resident (model + batch << VMEM)
        in_specs=[pl.BlockSpec(memory_space=pltpu.MemorySpace.VMEM) for _ in args],
        out_specs=pl.BlockSpec(memory_space=pltpu.MemorySpace.VMEM),
        out_shape=jax.ShapeDtypeStruct((B * T, VOCAB_PAD), jnp.float32),
    )(*args)
    return logits_pad.reshape(B, T, VOCAB_PAD)[..., :VOCAB]


# -------------------------- deterministic parameters --------------------------
def init_params(key):
    def nrm(k, shape, scale=0.02):
        return (scale * jax.random.normal(k, shape)).astype(jnp.float32)

    keys = iter(jax.random.split(key, 8 + N_LAYER * 8))
    params = {
        "tok_emb": nrm(next(keys), (VOCAB, N_EMBD), 1.0),
        "pos_emb": nrm(next(keys), (BLOCK_SIZE, N_EMBD), 1.0),
        "lnf_g": jnp.ones((1, N_EMBD), jnp.float32),
        "lnf_b": jnp.zeros((1, N_EMBD), jnp.float32),
        "w_lm": nrm(next(keys), (N_EMBD, VOCAB)),
        "b_lm": jnp.zeros((1, VOCAB), jnp.float32),
        "layers": [],
    }
    for _ in range(N_LAYER):
        lp = {
            "ln1_g": jnp.ones((1, N_EMBD), jnp.float32),
            "ln1_b": jnp.zeros((1, N_EMBD), jnp.float32),
            "wq": nrm(next(keys), (N_EMBD, N_EMBD)),
            "wk": nrm(next(keys), (N_EMBD, N_EMBD)),
            "wv": nrm(next(keys), (N_EMBD, N_EMBD)),
            "wproj": nrm(next(keys), (N_EMBD, N_EMBD)),
            "bproj": jnp.zeros((1, N_EMBD), jnp.float32),
            "ln2_g": jnp.ones((1, N_EMBD), jnp.float32),
            "ln2_b": jnp.zeros((1, N_EMBD), jnp.float32),
            "w1": nrm(next(keys), (N_EMBD, 4 * N_EMBD)),
            "b1": jnp.zeros((1, 4 * N_EMBD), jnp.float32),
            "w2": nrm(next(keys), (4 * N_EMBD, N_EMBD)),
            "b2": jnp.zeros((1, N_EMBD), jnp.float32),
        }
        params["layers"].append(lp)
    return params


# ------------------------------ pure-JAX reference -----------------------------
def reference_forward(index, params):
    B, T = index.shape
    x = params["tok_emb"][index] + params["pos_emb"][:T][None]

    def ln(x, g, b):
        mu = x.mean(-1, keepdims=True)
        var = ((x - mu) ** 2).mean(-1, keepdims=True)
        return (x - mu) / jnp.sqrt(var + EPS) * g + b

    row = jnp.arange(T)[:, None]
    col = jnp.arange(T)[None, :]
    causal = col <= row
    for lp in params["layers"]:
        xn = ln(x, lp["ln1_g"][0], lp["ln1_b"][0])
        q = xn @ lp["wq"]; k = xn @ lp["wk"]; v = xn @ lp["wv"]
        outs = []
        for h in range(N_HEAD):
            sl = slice(h * HEAD_SIZE, (h + 1) * HEAD_SIZE)
            wei = (q[..., sl] @ jnp.swapaxes(k[..., sl], -1, -2)) * N_EMBD ** -0.5
            wei = jnp.where(causal, wei, -jnp.inf)
            wei = jax.nn.softmax(wei, axis=-1)
            outs.append(wei @ v[..., sl])
        x = x + jnp.concatenate(outs, -1) @ lp["wproj"] + lp["bproj"][0]
        xn2 = ln(x, lp["ln2_g"][0], lp["ln2_b"][0])
        x = x + jax.nn.relu(xn2 @ lp["w1"] + lp["b1"][0]) @ lp["w2"] + lp["b2"][0]
    xf = ln(x, params["lnf_g"][0], params["lnf_b"][0])
    return xf @ params["w_lm"] + params["b_lm"][0]


if __name__ == "__main__":
    key = jax.random.PRNGKey(0)
    k_idx, k_par = jax.random.split(key)
    B, T = 2, 8
    index = jax.random.randint(k_idx, (B, T), 0, VOCAB, dtype=jnp.int32)
    params = init_params(k_par)

    # Pack parameters ONCE (outside the jitted per-call path).
    kp = prepare_kernel_params(params)

    logits = jax.block_until_ready(bigram_forward(index, kp))
    assert logits.shape == (B, T, VOCAB)

    ref = reference_forward(index, params)
    # Tolerance covers the EUP approx-reciprocal in the softmax (sub-1e-3
    # relative); any structural error would be orders of magnitude larger.
    assert jnp.allclose(logits, ref, atol=1e-2, rtol=1e-2), "mismatch vs reference"

    print("KERNEL_OK")
</pallas_src>

<mosaic_0001>
module attributes {stable_mosaic.version = 11 : i64} {
  func.func @gpt_forward_kernel(%arg0: memref<16x1xi32, #tpu.memory_space<vmem>>, %arg1: memref<64x32xf32, #tpu.memory_space<vmem>>, %arg2: memref<8x32xf32, #tpu.memory_space<vmem>>, %arg3: memref<2x1x32xf32, #tpu.memory_space<vmem>>, %arg4: memref<2x1x32xf32, #tpu.memory_space<vmem>>, %arg5: memref<2x32x96xf32, #tpu.memory_space<vmem>>, %arg6: memref<2x32x32xf32, #tpu.memory_space<vmem>>, %arg7: memref<2x1x32xf32, #tpu.memory_space<vmem>>, %arg8: memref<2x1x32xf32, #tpu.memory_space<vmem>>, %arg9: memref<2x1x32xf32, #tpu.memory_space<vmem>>, %arg10: memref<2x32x128xf32, #tpu.memory_space<vmem>>, %arg11: memref<2x1x128xf32, #tpu.memory_space<vmem>>, %arg12: memref<2x128x32xf32, #tpu.memory_space<vmem>>, %arg13: memref<2x1x32xf32, #tpu.memory_space<vmem>>, %arg14: memref<1x32xf32, #tpu.memory_space<vmem>>, %arg15: memref<1x32xf32, #tpu.memory_space<vmem>>, %arg16: memref<32x128xf32, #tpu.memory_space<vmem>>, %arg17: memref<1x128xf32, #tpu.memory_space<vmem>>, %arg18: memref<16x128xf32, #tpu.memory_space<vmem>>) attributes {dimension_semantics = [], scalar_prefetch = 0 : i64, scratch_operands = 0 : i64, tpu.core_type = #tpu.core_type<tc>} {
    %c0 = arith.constant 0 : index
    %c0_0 = arith.constant 0 : index
    %0 = vector.load %arg0[%c0, %c0_0] : memref<16x1xi32, #tpu.memory_space<vmem>>, vector<16x1xi32>
    %1 = tpu.iota {dimensions = array<i32: 1>} : vector<16x64xi32>
    %2 = vector.broadcast %0 : vector<16x1xi32> to vector<16x64xi32>
    %3 = arith.cmpi eq, %1, %2 : vector<16x64xi32>
    %4 = arith.extui %3 : vector<16x64xi1> to vector<16x64xi32>
    %5 = arith.sitofp %4 : vector<16x64xi32> to vector<16x64xf32>
    %c0_1 = arith.constant 0 : index
    %c0_2 = arith.constant 0 : index
    %6 = vector.load %arg1[%c0_1, %c0_2] : memref<64x32xf32, #tpu.memory_space<vmem>>, vector<64x32xf32>
    %cst = arith.constant dense<0.000000e+00> : vector<16x32xf32>
    %7 = tpu.matmul %5, %6, %cst {dimension_numbers = #tpu.dot_dimension_numbers<[1], [0], [0], [1], [0, 0, 1, 1], [], []>} : vector<16x64xf32>, vector<64x32xf32>, vector<16x32xf32> -> vector<16x32xf32>
    %c0_3 = arith.constant 0 : index
    %c0_4 = arith.constant 0 : index
    %8 = vector.load %arg2[%c0_3, %c0_4] : memref<8x32xf32, #tpu.memory_space<vmem>>, vector<8x32xf32>
    %9 = tpu.concatenate %8, %8 in 0 : vector<8x32xf32>, vector<8x32xf32> -> vector<16x32xf32>
    %10 = arith.addf %7, %9 : vector<16x32xf32>
    %11 = tpu.iota {dimensions = array<i32: 0>} : vector<8x8xi32>
    %12 = tpu.iota {dimensions = array<i32: 1>} : vector<8x8xi32>
    %13 = arith.cmpi sle, %12, %11 : vector<8x8xi32>
    %cst_5 = arith.constant 0.000000e+00 : f32
    %cst_6 = arith.constant -1.000000e+30 : f32
    %14 = vector.broadcast %cst_5 : f32 to vector<8x8xf32>
    %15 = vector.broadcast %cst_6 : f32 to vector<8x8xf32>
    %16 = arith.select %13, %14, %15 : vector<8x8xi1>, vector<8x8xf32>
    %17 = vector.shape_cast %16 : vector<8x8xf32> to vector<1x8x8xf32>
    %c0_7 = arith.constant 0 : index
    %c0_8 = arith.constant 0 : index
    %c0_9 = arith.constant 0 : index
    %18 = vector.load %arg3[%c0_7, %c0_8, %c0_9] : memref<2x1x32xf32, #tpu.memory_space<vmem>>, vector<1x1x32xf32>
    %19 = vector.shape_cast %18 : vector<1x1x32xf32> to vector<1x32xf32>
    %c0_10 = arith.constant 0 : index
    %c0_11 = arith.constant 0 : index
    %c0_12 = arith.constant 0 : index
    %20 = vector.load %arg4[%c0_10, %c0_11, %c0_12] : memref<2x1x32xf32, #tpu.memory_space<vmem>>, vector<1x1x32xf32>
    %21 = vector.shape_cast %20 : vector<1x1x32xf32> to vector<1x32xf32>
    %cst_13 = arith.constant dense<0.000000e+00> : vector<16xf32>
    %22 = vector.multi_reduction <add>, %10, %cst_13 [1] : vector<16x32xf32> to vector<16xf32>
    %23 = vector.shape_cast %22 : vector<16xf32> to vector<16x1xf32>
    %cst_14 = arith.constant 3.200000e+01 : f32
    %24 = vector.broadcast %cst_14 : f32 to vector<16x1xf32>
    %25 = arith.divf %23, %24 : vector<16x1xf32>
    %26 = arith.mulf %10, %10 : vector<16x32xf32>
    %cst_15 = arith.constant dense<0.000000e+00> : vector<16xf32>
    %27 = vector.multi_reduction <add>, %26, %cst_15 [1] : vector<16x32xf32> to vector<16xf32>
    %28 = vector.shape_cast %27 : vector<16xf32> to vector<16x1xf32>
    %cst_16 = arith.constant 3.200000e+01 : f32
    %29 = vector.broadcast %cst_16 : f32 to vector<16x1xf32>
    %30 = arith.divf %28, %29 : vector<16x1xf32>
    %31 = arith.mulf %25, %25 : vector<16x1xf32>
    %32 = arith.subf %30, %31 : vector<16x1xf32>
    %33 = vector.broadcast %25 : vector<16x1xf32> to vector<16x32xf32>
    %34 = arith.subf %10, %33 : vector<16x32xf32>
    %cst_17 = arith.constant 9.99999974E-6 : f32
    %35 = vector.broadcast %cst_17 : f32 to vector<16x1xf32>
    %36 = arith.addf %32, %35 : vector<16x1xf32>
    %37 = math.rsqrt %36 : vector<16x1xf32>
    %38 = vector.broadcast %37 : vector<16x1xf32> to vector<16x32xf32>
    %39 = arith.mulf %34, %38 : vector<16x32xf32>
    %40 = vector.broadcast %19 : vector<1x32xf32> to vector<16x32xf32>
    %41 = arith.mulf %39, %40 : vector<16x32xf32>
    %42 = vector.broadcast %21 : vector<1x32xf32> to vector<16x32xf32>
    %43 = arith.addf %41, %42 : vector<16x32xf32>
    %c0_18 = arith.constant 0 : index
    %c0_19 = arith.constant 0 : index
    %c0_20 = arith.constant 0 : index
    %44 = vector.load %arg5[%c0_18, %c0_19, %c0_20] : memref<2x32x96xf32, #tpu.memory_space<vmem>>, vector<1x32x96xf32>
    %45 = vector.shape_cast %44 : vector<1x32x96xf32> to vector<32x96xf32>
    %cst_21 = arith.constant dense<0.000000e+00> : vector<16x96xf32>
    %46 = tpu.matmul %43, %45, %cst_21 {dimension_numbers = #tpu.dot_dimension_numbers<[1], [0], [0], [1], [0, 0, 1, 1], [], []>} : vector<16x32xf32>, vector<32x96xf32>, vector<16x96xf32> -> vector<16x96xf32>
    %47 = vector.extract_strided_slice %46 {offsets = [0, 0], sizes = [16, 8], strides = [1, 1]} : vector<16x96xf32> to vector<16x8xf32>
    %48 = vector.shape_cast %47 : vector<16x8xf32> to vector<2x8x8xf32>
    %49 = vector.extract_strided_slice %46 {offsets = [0, 8], sizes = [16, 8], strides = [1, 1]} : vector<16x96xf32> to vector<16x8xf32>
    %50 = vector.shape_cast %49 : vector<16x8xf32> to vector<2x8x8xf32>
    %51 = vector.extract_strided_slice %46 {offsets = [0, 16], sizes = [16, 8], strides = [1, 1]} : vector<16x96xf32> to vector<16x8xf32>
    %52 = vector.shape_cast %51 : vector<16x8xf32> to vector<2x8x8xf32>
    %53 = vector.extract_strided_slice %46 {offsets = [0, 24], sizes = [16, 8], strides = [1, 1]} : vector<16x96xf32> to vector<16x8xf32>
    %54 = vector.shape_cast %53 : vector<16x8xf32> to vector<2x8x8xf32>
    %55 = tpu.concatenate %48, %50, %52, %54 in 0 : vector<2x8x8xf32>, vector<2x8x8xf32>, vector<2x8x8xf32>, vector<2x8x8xf32> -> vector<8x8x8xf32>
    %56 = vector.extract_strided_slice %46 {offsets = [0, 32], sizes = [16, 8], strides = [1, 1]} : vector<16x96xf32> to vector<16x8xf32>
    %57 = vector.shape_cast %56 : vector<16x8xf32> to vector<2x8x8xf32>
    %58 = vector.extract_strided_slice %46 {offsets = [0, 40], sizes = [16, 8], strides = [1, 1]} : vector<16x96xf32> to vector<16x8xf32>
    %59 = vector.shape_cast %58 : vector<16x8xf32> to vector<2x8x8xf32>
    %60 = vector.extract_strided_slice %46 {offsets = [0, 48], sizes = [16, 8], strides = [1, 1]} : vector<16x96xf32> to vector<16x8xf32>
    %61 = vector.shape_cast %60 : vector<16x8xf32> to vector<2x8x8xf32>
    %62 = vector.extract_strided_slice %46 {offsets = [0, 56], sizes = [16, 8], strides = [1, 1]} : vector<16x96xf32> to vector<16x8xf32>
    %63 = vector.shape_cast %62 : vector<16x8xf32> to vector<2x8x8xf32>
    %64 = tpu.concatenate %57, %59, %61, %63 in 0 : vector<2x8x8xf32>, vector<2x8x8xf32>, vector<2x8x8xf32>, vector<2x8x8xf32> -> vector<8x8x8xf32>
    %65 = vector.extract_strided_slice %46 {offsets = [0, 64], sizes = [16, 8], strides = [1, 1]} : vector<16x96xf32> to vector<16x8xf32>
    %66 = vector.shape_cast %65 : vector<16x8xf32> to vector<2x8x8xf32>
    %67 = vector.extract_strided_slice %46 {offsets = [0, 72], sizes = [16, 8], strides = [1, 1]} : vector<16x96xf32> to vector<16x8xf32>
    %68 = vector.shape_cast %67 : vector<16x8xf32> to vector<2x8x8xf32>
    %69 = vector.extract_strided_slice %46 {offsets = [0, 80], sizes = [16, 8], strides = [1, 1]} : vector<16x96xf32> to vector<16x8xf32>
    %70 = vector.shape_cast %69 : vector<16x8xf32> to vector<2x8x8xf32>
    %71 = vector.extract_strided_slice %46 {offsets = [0, 88], sizes = [16, 8], strides = [1, 1]} : vector<16x96xf32> to vector<16x8xf32>
    %72 = vector.shape_cast %71 : vector<16x8xf32> to vector<2x8x8xf32>
    %73 = tpu.concatenate %66, %68, %70, %72 in 0 : vector<2x8x8xf32>, vector<2x8x8xf32>, vector<2x8x8xf32>, vector<2x8x8xf32> -> vector<8x8x8xf32>
    "tpu.trace_start"() <{level = 10 : i32, message = "bqd,bkd->bqk"}> : () -> ()
    %cst_22 = arith.constant dense<0.000000e+00> : vector<8x8x8xf32>
    %74 = tpu.matmul %55, %64, %cst_22 {dimension_numbers = #tpu.dot_dimension_numbers<[2], [2], [1], [1], [0, 0, 0, 1, 1, 1], [0], [0]>} : vector<8x8x8xf32>, vector<8x8x8xf32>, vector<8x8x8xf32> -> vector<8x8x8xf32>
    "tpu.trace_stop"() : () -> ()
    %75 = vector.broadcast %17 : vector<1x8x8xf32> to vector<8x8x8xf32>
    %76 = arith.addf %74, %75 : vector<8x8x8xf32>
    %cst_23 = arith.constant dense<0xFF800000> : vector<8x8xf32>
    %77 = vector.multi_reduction <maximumf>, %76, %cst_23 [2] : vector<8x8x8xf32> to vector<8x8xf32>
    %78 = vector.shape_cast %77 : vector<8x8xf32> to vector<8x8x1xf32>
    %79 = vector.broadcast %78 : vector<8x8x1xf32> to vector<8x8x8xf32>
    %80 = arith.subf %76, %79 : vector<8x8x8xf32>
    %81 = math.exp %80 : vector<8x8x8xf32>
    %cst_24 = arith.constant dense<0.000000e+00> : vector<8x8xf32>
    %82 = vector.multi_reduction <add>, %81, %cst_24 [2] : vector<8x8x8xf32> to vector<8x8xf32>
    %83 = vector.shape_cast %82 : vector<8x8xf32> to vector<8x8x1xf32>
    %84 = tpu.reciprocal %83 {approx = true} : vector<8x8x1xf32> -> vector<8x8x1xf32>
    %85 = vector.broadcast %84 : vector<8x8x1xf32> to vector<8x8x8xf32>
    %86 = arith.mulf %81, %85 : vector<8x8x8xf32>
    "tpu.trace_start"() <{level = 10 : i32, message = "bqk,bkd->bqd"}> : () -> ()
    %cst_25 = arith.constant dense<0.000000e+00> : vector<8x8x8xf32>
    %87 = tpu.matmul %86, %73, %cst_25 {dimension_numbers = #tpu.dot_dimension_numbers<[2], [1], [1], [2], [0, 0, 0, 1, 1, 2], [0], [0]>} : vector<8x8x8xf32>, vector<8x8x8xf32>, vector<8x8x8xf32> -> vector<8x8x8xf32>
    "tpu.trace_stop"() : () -> ()
    %88 = vector.shape_cast %87 : vector<8x8x8xf32> to vector<4x16x8xf32>
    %89 = vector.extract_strided_slice %88 {offsets = [0, 0, 0], sizes = [1, 16, 8], strides = [1, 1, 1]} : vector<4x16x8xf32> to vector<1x16x8xf32>
    %90 = vector.shape_cast %89 : vector<1x16x8xf32> to vector<16x8xf32>
    %91 = vector.extract_strided_slice %88 {offsets = [1, 0, 0], sizes = [1, 16, 8], strides = [1, 1, 1]} : vector<4x16x8xf32> to vector<1x16x8xf32>
    %92 = vector.shape_cast %91 : vector<1x16x8xf32> to vector<16x8xf32>
    %93 = vector.extract_strided_slice %88 {offsets = [2, 0, 0], sizes = [1, 16, 8], strides = [1, 1, 1]} : vector<4x16x8xf32> to vector<1x16x8xf32>
    %94 = vector.shape_cast %93 : vector<1x16x8xf32> to vector<16x8xf32>
    %95 = vector.extract_strided_slice %88 {offsets = [3, 0, 0], sizes = [1, 16, 8], strides = [1, 1, 1]} : vector<4x16x8xf32> to vector<1x16x8xf32>
    %96 = vector.shape_cast %95 : vector<1x16x8xf32> to vector<16x8xf32>
    %97 = tpu.concatenate %90, %92, %94, %96 in 1 : vector<16x8xf32>, vector<16x8xf32>, vector<16x8xf32>, vector<16x8xf32> -> vector<16x32xf32>
    %c0_26 = arith.constant 0 : index
    %c0_27 = arith.constant 0 : index
    %c0_28 = arith.constant 0 : index
    %98 = vector.load %arg6[%c0_26, %c0_27, %c0_28] : memref<2x32x32xf32, #tpu.memory_space<vmem>>, vector<1x32x32xf32>
    %99 = vector.shape_cast %98 : vector<1x32x32xf32> to vector<32x32xf32>
    %cst_29 = arith.constant dense<0.000000e+00> : vector<16x32xf32>
    %100 = tpu.matmul %97, %99, %cst_29 {dimension_numbers = #tpu.dot_dimension_numbers<[1], [0], [0], [1], [0, 0, 1, 1], [], []>} : vector<16x32xf32>, vector<32x32xf32>, vector<16x32xf32> -> vector<16x32xf32>
    %101 = arith.addf %10, %100 : vector<16x32xf32>
    %c0_30 = arith.constant 0 : index
    %c0_31 = arith.constant 0 : index
    %c0_32 = arith.constant 0 : index
    %102 = vector.load %arg7[%c0_30, %c0_31, %c0_32] : memref<2x1x32xf32, #tpu.memory_space<vmem>>, vector<1x1x32xf32>
    %103 = vector.shape_cast %102 : vector<1x1x32xf32> to vector<1x32xf32>
    %104 = vector.broadcast %103 : vector<1x32xf32> to vector<16x32xf32>
    %105 = arith.addf %101, %104 : vector<16x32xf32>
    %c0_33 = arith.constant 0 : index
    %c0_34 = arith.constant 0 : index
    %c0_35 = arith.constant 0 : index
    %106 = vector.load %arg8[%c0_33, %c0_34, %c0_35] : memref<2x1x32xf32, #tpu.memory_space<vmem>>, vector<1x1x32xf32>
    %107 = vector.shape_cast %106 : vector<1x1x32xf32> to vector<1x32xf32>
    %c0_36 = arith.constant 0 : index
    %c0_37 = arith.constant 0 : index
    %c0_38 = arith.constant 0 : index
    %108 = vector.load %arg9[%c0_36, %c0_37, %c0_38] : memref<2x1x32xf32, #tpu.memory_space<vmem>>, vector<1x1x32xf32>
    %109 = vector.shape_cast %108 : vector<1x1x32xf32> to vector<1x32xf32>
    %cst_39 = arith.constant dense<0.000000e+00> : vector<16xf32>
    %110 = vector.multi_reduction <add>, %105, %cst_39 [1] : vector<16x32xf32> to vector<16xf32>
    %111 = vector.shape_cast %110 : vector<16xf32> to vector<16x1xf32>
    %cst_40 = arith.constant 3.200000e+01 : f32
    %112 = vector.broadcast %cst_40 : f32 to vector<16x1xf32>
    %113 = arith.divf %111, %112 : vector<16x1xf32>
    %114 = arith.mulf %105, %105 : vector<16x32xf32>
    %cst_41 = arith.constant dense<0.000000e+00> : vector<16xf32>
    %115 = vector.multi_reduction <add>, %114, %cst_41 [1] : vector<16x32xf32> to vector<16xf32>
    %116 = vector.shape_cast %115 : vector<16xf32> to vector<16x1xf32>
    %cst_42 = arith.constant 3.200000e+01 : f32
    %117 = vector.broadcast %cst_42 : f32 to vector<16x1xf32>
    %118 = arith.divf %116, %117 : vector<16x1xf32>
    %119 = arith.mulf %113, %113 : vector<16x1xf32>
    %120 = arith.subf %118, %119 : vector<16x1xf32>
    %121 = vector.broadcast %113 : vector<16x1xf32> to vector<16x32xf32>
    %122 = arith.subf %105, %121 : vector<16x32xf32>
    %cst_43 = arith.constant 9.99999974E-6 : f32
    %123 = vector.broadcast %cst_43 : f32 to vector<16x1xf32>
    %124 = arith.addf %120, %123 : vector<16x1xf32>
    %125 = math.rsqrt %124 : vector<16x1xf32>
    %126 = vector.broadcast %125 : vector<16x1xf32> to vector<16x32xf32>
    %127 = arith.mulf %122, %126 : vector<16x32xf32>
    %128 = vector.broadcast %107 : vector<1x32xf32> to vector<16x32xf32>
    %129 = arith.mulf %127, %128 : vector<16x32xf32>
    %130 = vector.broadcast %109 : vector<1x32xf32> to vector<16x32xf32>
    %131 = arith.addf %129, %130 : vector<16x32xf32>
    %c0_44 = arith.constant 0 : index
    %c0_45 = arith.constant 0 : index
    %c0_46 = arith.constant 0 : index
    %132 = vector.load %arg10[%c0_44, %c0_45, %c0_46] : memref<2x32x128xf32, #tpu.memory_space<vmem>>, vector<1x32x128xf32>
    %133 = vector.shape_cast %132 : vector<1x32x128xf32> to vector<32x128xf32>
    %cst_47 = arith.constant dense<0.000000e+00> : vector<16x128xf32>
    %134 = tpu.matmul %131, %133, %cst_47 {dimension_numbers = #tpu.dot_dimension_numbers<[1], [0], [0], [1], [0, 0, 1, 1], [], []>} : vector<16x32xf32>, vector<32x128xf32>, vector<16x128xf32> -> vector<16x128xf32>
    %c0_48 = arith.constant 0 : index
    %c0_49 = arith.constant 0 : index
    %c0_50 = arith.constant 0 : index
    %135 = vector.load %arg11[%c0_48, %c0_49, %c0_50] : memref<2x1x128xf32, #tpu.memory_space<vmem>>, vector<1x1x128xf32>
    %136 = vector.shape_cast %135 : vector<1x1x128xf32> to vector<1x128xf32>
    %137 = vector.broadcast %136 : vector<1x128xf32> to vector<16x128xf32>
    %138 = arith.addf %134, %137 : vector<16x128xf32>
    %cst_51 = arith.constant 0.000000e+00 : f32
    %139 = vector.broadcast %cst_51 : f32 to vector<16x128xf32>
    %140 = arith.maximumf %138, %139 : vector<16x128xf32>
    %c0_52 = arith.constant 0 : index
    %c0_53 = arith.constant 0 : index
    %c0_54 = arith.constant 0 : index
    %141 = vector.load %arg12[%c0_52, %c0_53, %c0_54] : memref<2x128x32xf32, #tpu.memory_space<vmem>>, vector<1x128x32xf32>
    %142 = vector.shape_cast %141 : vector<1x128x32xf32> to vector<128x32xf32>
    %cst_55 = arith.constant dense<0.000000e+00> : vector<16x32xf32>
    %143 = tpu.matmul %140, %142, %cst_55 {dimension_numbers = #tpu.dot_dimension_numbers<[1], [0], [0], [1], [0, 0, 1, 1], [], []>} : vector<16x128xf32>, vector<128x32xf32>, vector<16x32xf32> -> vector<16x32xf32>
    %144 = arith.addf %105, %143 : vector<16x32xf32>
    %c0_56 = arith.constant 0 : index
    %c0_57 = arith.constant 0 : index
    %c0_58 = arith.constant 0 : index
    %145 = vector.load %arg13[%c0_56, %c0_57, %c0_58] : memref<2x1x32xf32, #tpu.memory_space<vmem>>, vector<1x1x32xf32>
    %146 = vector.shape_cast %145 : vector<1x1x32xf32> to vector<1x32xf32>
    %147 = vector.broadcast %146 : vector<1x32xf32> to vector<16x32xf32>
    %148 = arith.addf %144, %147 : vector<16x32xf32>
    %c1 = arith.constant 1 : index
    %c0_59 = arith.constant 0 : index
    %c0_60 = arith.constant 0 : index
    %149 = vector.load %arg3[%c1, %c0_59, %c0_60] : memref<2x1x32xf32, #tpu.memory_space<vmem>>, vector<1x1x32xf32>
    %150 = vector.shape_cast %149 : vector<1x1x32xf32> to vector<1x32xf32>
    %c1_61 = arith.constant 1 : index
    %c0_62 = arith.constant 0 : index
    %c0_63 = arith.constant 0 : index
    %151 = vector.load %arg4[%c1_61, %c0_62, %c0_63] : memref<2x1x32xf32, #tpu.memory_space<vmem>>, vector<1x1x32xf32>
    %152 = vector.shape_cast %151 : vector<1x1x32xf32> to vector<1x32xf32>
    %cst_64 = arith.constant dense<0.000000e+00> : vector<16xf32>
    %153 = vector.multi_reduction <add>, %148, %cst_64 [1] : vector<16x32xf32> to vector<16xf32>
    %154 = vector.shape_cast %153 : vector<16xf32> to vector<16x1xf32>
    %cst_65 = arith.constant 3.200000e+01 : f32
    %155 = vector.broadcast %cst_65 : f32 to vector<16x1xf32>
    %156 = arith.divf %154, %155 : vector<16x1xf32>
    %157 = arith.mulf %148, %148 : vector<16x32xf32>
    %cst_66 = arith.constant dense<0.000000e+00> : vector<16xf32>
    %158 = vector.multi_reduction <add>, %157, %cst_66 [1] : vector<16x32xf32> to vector<16xf32>
    %159 = vector.shape_cast %158 : vector<16xf32> to vector<16x1xf32>
    %cst_67 = arith.constant 3.200000e+01 : f32
    %160 = vector.broadcast %cst_67 : f32 to vector<16x1xf32>
    %161 = arith.divf %159, %160 : vector<16x1xf32>
    %162 = arith.mulf %156, %156 : vector<16x1xf32>
    %163 = arith.subf %161, %162 : vector<16x1xf32>
    %164 = vector.broadcast %156 : vector<16x1xf32> to vector<16x32xf32>
    %165 = arith.subf %148, %164 : vector<16x32xf32>
    %cst_68 = arith.constant 9.99999974E-6 : f32
    %166 = vector.broadcast %cst_68 : f32 to vector<16x1xf32>
    %167 = arith.addf %163, %166 : vector<16x1xf32>
    %168 = math.rsqrt %167 : vector<16x1xf32>
    %169 = vector.broadcast %168 : vector<16x1xf32> to vector<16x32xf32>
    %170 = arith.mulf %165, %169 : vector<16x32xf32>
    %171 = vector.broadcast %150 : vector<1x32xf32> to vector<16x32xf32>
    %172 = arith.mulf %170, %171 : vector<16x32xf32>
    %173 = vector.broadcast %152 : vector<1x32xf32> to vector<16x32xf32>
    %174 = arith.addf %172, %173 : vector<16x32xf32>
    %c1_69 = arith.constant 1 : index
    %c0_70 = arith.constant 0 : index
    %c0_71 = arith.constant 0 : index
    %175 = vector.load %arg5[%c1_69, %c0_70, %c0_71] : memref<2x32x96xf32, #tpu.memory_space<vmem>>, vector<1x32x96xf32>
    %176 = vector.shape_cast %175 : vector<1x32x96xf32> to vector<32x96xf32>
    %cst_72 = arith.constant dense<0.000000e+00> : vector<16x96xf32>
    %177 = tpu.matmul %174, %176, %cst_72 {dimension_numbers = #tpu.dot_dimension_numbers<[1], [0], [0], [1], [0, 0, 1, 1], [], []>} : vector<16x32xf32>, vector<32x96xf32>, vector<16x96xf32> -> vector<16x96xf32>
    %178 = vector.extract_strided_slice %177 {offsets = [0, 0], sizes = [16, 8], strides = [1, 1]} : vector<16x96xf32> to vector<16x8xf32>
    %179 = vector.shape_cast %178 : vector<16x8xf32> to vector<2x8x8xf32>
    %180 = vector.extract_strided_slice %177 {offsets = [0, 8], sizes = [16, 8], strides = [1, 1]} : vector<16x96xf32> to vector<16x8xf32>
    %181 = vector.shape_cast %180 : vector<16x8xf32> to vector<2x8x8xf32>
    %182 = vector.extract_strided_slice %177 {offsets = [0, 16], sizes = [16, 8], strides = [1, 1]} : vector<16x96xf32> to vector<16x8xf32>
    %183 = vector.shape_cast %182 : vector<16x8xf32> to vector<2x8x8xf32>
    %184 = vector.extract_strided_slice %177 {offsets = [0, 24], sizes = [16, 8], strides = [1, 1]} : vector<16x96xf32> to vector<16x8xf32>
    %185 = vector.shape_cast %184 : vector<16x8xf32> to vector<2x8x8xf32>
    %186 = tpu.concatenate %179, %181, %183, %185 in 0 : vector<2x8x8xf32>, vector<2x8x8xf32>, vector<2x8x8xf32>, vector<2x8x8xf32> -> vector<8x8x8xf32>
    %187 = vector.extract_strided_slice %177 {offsets = [0, 32], sizes = [16, 8], strides = [1, 1]} : vector<16x96xf32> to vector<16x8xf32>
    %188 = vector.shape_cast %187 : vector<16x8xf32> to vector<2x8x8xf32>
    %189 = vector.extract_strided_slice %177 {offsets = [0, 40], sizes = [16, 8], strides = [1, 1]} : vector<16x96xf32> to vector<16x8xf32>
    %190 = vector.shape_cast %189 : vector<16x8xf32> to vector<2x8x8xf32>
    %191 = vector.extract_strided_slice %177 {offsets = [0, 48], sizes = [16, 8], strides = [1, 1]} : vector<16x96xf32> to vector<16x8xf32>
    %192 = vector.shape_cast %191 : vector<16x8xf32> to vector<2x8x8xf32>
    %193 = vector.extract_strided_slice %177 {offsets = [0, 56], sizes = [16, 8], strides = [1, 1]} : vector<16x96xf32> to vector<16x8xf32>
    %194 = vector.shape_cast %193 : vector<16x8xf32> to vector<2x8x8xf32>
    %195 = tpu.concatenate %188, %190, %192, %194 in 0 : vector<2x8x8xf32>, vector<2x8x8xf32>, vector<2x8x8xf32>, vector<2x8x8xf32> -> vector<8x8x8xf32>
    %196 = vector.extract_strided_slice %177 {offsets = [0, 64], sizes = [16, 8], strides = [1, 1]} : vector<16x96xf32> to vector<16x8xf32>
    %197 = vector.shape_cast %196 : vector<16x8xf32> to vector<2x8x8xf32>
    %198 = vector.extract_strided_slice %177 {offsets = [0, 72], sizes = [16, 8], strides = [1, 1]} : vector<16x96xf32> to vector<16x8xf32>
    %199 = vector.shape_cast %198 : vector<16x8xf32> to vector<2x8x8xf32>
    %200 = vector.extract_strided_slice %177 {offsets = [0, 80], sizes = [16, 8], strides = [1, 1]} : vector<16x96xf32> to vector<16x8xf32>
    %201 = vector.shape_cast %200 : vector<16x8xf32> to vector<2x8x8xf32>
    %202 = vector.extract_strided_slice %177 {offsets = [0, 88], sizes = [16, 8], strides = [1, 1]} : vector<16x96xf32> to vector<16x8xf32>
    %203 = vector.shape_cast %202 : vector<16x8xf32> to vector<2x8x8xf32>
    %204 = tpu.concatenate %197, %199, %201, %203 in 0 : vector<2x8x8xf32>, vector<2x8x8xf32>, vector<2x8x8xf32>, vector<2x8x8xf32> -> vector<8x8x8xf32>
    "tpu.trace_start"() <{level = 10 : i32, message = "bqd,bkd->bqk"}> : () -> ()
    %cst_73 = arith.constant dense<0.000000e+00> : vector<8x8x8xf32>
    %205 = tpu.matmul %186, %195, %cst_73 {dimension_numbers = #tpu.dot_dimension_numbers<[2], [2], [1], [1], [0, 0, 0, 1, 1, 1], [0], [0]>} : vector<8x8x8xf32>, vector<8x8x8xf32>, vector<8x8x8xf32> -> vector<8x8x8xf32>
    "tpu.trace_stop"() : () -> ()
    %206 = vector.broadcast %17 : vector<1x8x8xf32> to vector<8x8x8xf32>
    %207 = arith.addf %205, %206 : vector<8x8x8xf32>
    %cst_74 = arith.constant dense<0xFF800000> : vector<8x8xf32>
    %208 = vector.multi_reduction <maximumf>, %207, %cst_74 [2] : vector<8x8x8xf32> to vector<8x8xf32>
    %209 = vector.shape_cast %208 : vector<8x8xf32> to vector<8x8x1xf32>
    %210 = vector.broadcast %209 : vector<8x8x1xf32> to vector<8x8x8xf32>
    %211 = arith.subf %207, %210 : vector<8x8x8xf32>
    %212 = math.exp %211 : vector<8x8x8xf32>
    %cst_75 = arith.constant dense<0.000000e+00> : vector<8x8xf32>
    %213 = vector.multi_reduction <add>, %212, %cst_75 [2] : vector<8x8x8xf32> to vector<8x8xf32>
    %214 = vector.shape_cast %213 : vector<8x8xf32> to vector<8x8x1xf32>
    %215 = tpu.reciprocal %214 {approx = true} : vector<8x8x1xf32> -> vector<8x8x1xf32>
    %216 = vector.broadcast %215 : vector<8x8x1xf32> to vector<8x8x8xf32>
    %217 = arith.mulf %212, %216 : vector<8x8x8xf32>
    "tpu.trace_start"() <{level = 10 : i32, message = "bqk,bkd->bqd"}> : () -> ()
    %cst_76 = arith.constant dense<0.000000e+00> : vector<8x8x8xf32>
    %218 = tpu.matmul %217, %204, %cst_76 {dimension_numbers = #tpu.dot_dimension_numbers<[2], [1], [1], [2], [0, 0, 0, 1, 1, 2], [0], [0]>} : vector<8x8x8xf32>, vector<8x8x8xf32>, vector<8x8x8xf32> -> vector<8x8x8xf32>
    "tpu.trace_stop"() : () -> ()
    %219 = vector.shape_cast %218 : vector<8x8x8xf32> to vector<4x16x8xf32>
    %220 = vector.extract_strided_slice %219 {offsets = [0, 0, 0], sizes = [1, 16, 8], strides = [1, 1, 1]} : vector<4x16x8xf32> to vector<1x16x8xf32>
    %221 = vector.shape_cast %220 : vector<1x16x8xf32> to vector<16x8xf32>
    %222 = vector.extract_strided_slice %219 {offsets = [1, 0, 0], sizes = [1, 16, 8], strides = [1, 1, 1]} : vector<4x16x8xf32> to vector<1x16x8xf32>
    %223 = vector.shape_cast %222 : vector<1x16x8xf32> to vector<16x8xf32>
    %224 = vector.extract_strided_slice %219 {offsets = [2, 0, 0], sizes = [1, 16, 8], strides = [1, 1, 1]} : vector<4x16x8xf32> to vector<1x16x8xf32>
    %225 = vector.shape_cast %224 : vector<1x16x8xf32> to vector<16x8xf32>
    %226 = vector.extract_strided_slice %219 {offsets = [3, 0, 0], sizes = [1, 16, 8], strides = [1, 1, 1]} : vector<4x16x8xf32> to vector<1x16x8xf32>
    %227 = vector.shape_cast %226 : vector<1x16x8xf32> to vector<16x8xf32>
    %228 = tpu.concatenate %221, %223, %225, %227 in 1 : vector<16x8xf32>, vector<16x8xf32>, vector<16x8xf32>, vector<16x8xf32> -> vector<16x32xf32>
    %c1_77 = arith.constant 1 : index
    %c0_78 = arith.constant 0 : index
    %c0_79 = arith.constant 0 : index
    %229 = vector.load %arg6[%c1_77, %c0_78, %c0_79] : memref<2x32x32xf32, #tpu.memory_space<vmem>>, vector<1x32x32xf32>
    %230 = vector.shape_cast %229 : vector<1x32x32xf32> to vector<32x32xf32>
    %cst_80 = arith.constant dense<0.000000e+00> : vector<16x32xf32>
    %231 = tpu.matmul %228, %230, %cst_80 {dimension_numbers = #tpu.dot_dimension_numbers<[1], [0], [0], [1], [0, 0, 1, 1], [], []>} : vector<16x32xf32>, vector<32x32xf32>, vector<16x32xf32> -> vector<16x32xf32>
    %232 = arith.addf %148, %231 : vector<16x32xf32>
    %c1_81 = arith.constant 1 : index
    %c0_82 = arith.constant 0 : index
    %c0_83 = arith.constant 0 : index
    %233 = vector.load %arg7[%c1_81, %c0_82, %c0_83] : memref<2x1x32xf32, #tpu.memory_space<vmem>>, vector<1x1x32xf32>
    %234 = vector.shape_cast %233 : vector<1x1x32xf32> to vector<1x32xf32>
    %235 = vector.broadcast %234 : vector<1x32xf32> to vector<16x32xf32>
    %236 = arith.addf %232, %235 : vector<16x32xf32>
    %c1_84 = arith.constant 1 : index
    %c0_85 = arith.constant 0 : index
    %c0_86 = arith.constant 0 : index
    %237 = vector.load %arg8[%c1_84, %c0_85, %c0_86] : memref<2x1x32xf32, #tpu.memory_space<vmem>>, vector<1x1x32xf32>
    %238 = vector.shape_cast %237 : vector<1x1x32xf32> to vector<1x32xf32>
    %c1_87 = arith.constant 1 : index
    %c0_88 = arith.constant 0 : index
    %c0_89 = arith.constant 0 : index
    %239 = vector.load %arg9[%c1_87, %c0_88, %c0_89] : memref<2x1x32xf32, #tpu.memory_space<vmem>>, vector<1x1x32xf32>
    %240 = vector.shape_cast %239 : vector<1x1x32xf32> to vector<1x32xf32>
    %cst_90 = arith.constant dense<0.000000e+00> : vector<16xf32>
    %241 = vector.multi_reduction <add>, %236, %cst_90 [1] : vector<16x32xf32> to vector<16xf32>
    %242 = vector.shape_cast %241 : vector<16xf32> to vector<16x1xf32>
    %cst_91 = arith.constant 3.200000e+01 : f32
    %243 = vector.broadcast %cst_91 : f32 to vector<16x1xf32>
    %244 = arith.divf %242, %243 : vector<16x1xf32>
    %245 = arith.mulf %236, %236 : vector<16x32xf32>
    %cst_92 = arith.constant dense<0.000000e+00> : vector<16xf32>
    %246 = vector.multi_reduction <add>, %245, %cst_92 [1] : vector<16x32xf32> to vector<16xf32>
    %247 = vector.shape_cast %246 : vector<16xf32> to vector<16x1xf32>
    %cst_93 = arith.constant 3.200000e+01 : f32
    %248 = vector.broadcast %cst_93 : f32 to vector<16x1xf32>
    %249 = arith.divf %247, %248 : vector<16x1xf32>
    %250 = arith.mulf %244, %244 : vector<16x1xf32>
    %251 = arith.subf %249, %250 : vector<16x1xf32>
    %252 = vector.broadcast %244 : vector<16x1xf32> to vector<16x32xf32>
    %253 = arith.subf %236, %252 : vector<16x32xf32>
    %cst_94 = arith.constant 9.99999974E-6 : f32
    %254 = vector.broadcast %cst_94 : f32 to vector<16x1xf32>
    %255 = arith.addf %251, %254 : vector<16x1xf32>
    %256 = math.rsqrt %255 : vector<16x1xf32>
    %257 = vector.broadcast %256 : vector<16x1xf32> to vector<16x32xf32>
    %258 = arith.mulf %253, %257 : vector<16x32xf32>
    %259 = vector.broadcast %238 : vector<1x32xf32> to vector<16x32xf32>
    %260 = arith.mulf %258, %259 : vector<16x32xf32>
    %261 = vector.broadcast %240 : vector<1x32xf32> to vector<16x32xf32>
    %262 = arith.addf %260, %261 : vector<16x32xf32>
    %c1_95 = arith.constant 1 : index
    %c0_96 = arith.constant 0 : index
    %c0_97 = arith.constant 0 : index
    %263 = vector.load %arg10[%c1_95, %c0_96, %c0_97] : memref<2x32x128xf32, #tpu.memory_space<vmem>>, vector<1x32x128xf32>
    %264 = vector.shape_cast %263 : vector<1x32x128xf32> to vector<32x128xf32>
    %cst_98 = arith.constant dense<0.000000e+00> : vector<16x128xf32>
    %265 = tpu.matmul %262, %264, %cst_98 {dimension_numbers = #tpu.dot_dimension_numbers<[1], [0], [0], [1], [0, 0, 1, 1], [], []>} : vector<16x32xf32>, vector<32x128xf32>, vector<16x128xf32> -> vector<16x128xf32>
    %c1_99 = arith.constant 1 : index
    %c0_100 = arith.constant 0 : index
    %c0_101 = arith.constant 0 : index
    %266 = vector.load %arg11[%c1_99, %c0_100, %c0_101] : memref<2x1x128xf32, #tpu.memory_space<vmem>>, vector<1x1x128xf32>
    %267 = vector.shape_cast %266 : vector<1x1x128xf32> to vector<1x128xf32>
    %268 = vector.broadcast %267 : vector<1x128xf32> to vector<16x128xf32>
    %269 = arith.addf %265, %268 : vector<16x128xf32>
    %cst_102 = arith.constant 0.000000e+00 : f32
    %270 = vector.broadcast %cst_102 : f32 to vector<16x128xf32>
    %271 = arith.maximumf %269, %270 : vector<16x128xf32>
    %c1_103 = arith.constant 1 : index
    %c0_104 = arith.constant 0 : index
    %c0_105 = arith.constant 0 : index
    %272 = vector.load %arg12[%c1_103, %c0_104, %c0_105] : memref<2x128x32xf32, #tpu.memory_space<vmem>>, vector<1x128x32xf32>
    %273 = vector.shape_cast %272 : vector<1x128x32xf32> to vector<128x32xf32>
    %cst_106 = arith.constant dense<0.000000e+00> : vector<16x32xf32>
    %274 = tpu.matmul %271, %273, %cst_106 {dimension_numbers = #tpu.dot_dimension_numbers<[1], [0], [0], [1], [0, 0, 1, 1], [], []>} : vector<16x128xf32>, vector<128x32xf32>, vector<16x32xf32> -> vector<16x32xf32>
    %275 = arith.addf %236, %274 : vector<16x32xf32>
    %c1_107 = arith.constant 1 : index
    %c0_108 = arith.constant 0 : index
    %c0_109 = arith.constant 0 : index
    %276 = vector.load %arg13[%c1_107, %c0_108, %c0_109] : memref<2x1x32xf32, #tpu.memory_space<vmem>>, vector<1x1x32xf32>
    %277 = vector.shape_cast %276 : vector<1x1x32xf32> to vector<1x32xf32>
    %278 = vector.broadcast %277 : vector<1x32xf32> to vector<16x32xf32>
    %279 = arith.addf %275, %278 : vector<16x32xf32>
    %c0_110 = arith.constant 0 : index
    %c0_111 = arith.constant 0 : index
    %280 = vector.load %arg14[%c0_110, %c0_111] : memref<1x32xf32, #tpu.memory_space<vmem>>, vector<1x32xf32>
    %c0_112 = arith.constant 0 : index
    %c0_113 = arith.constant 0 : index
    %281 = vector.load %arg15[%c0_112, %c0_113] : memref<1x32xf32, #tpu.memory_space<vmem>>, vector<1x32xf32>
    %cst_114 = arith.constant dense<0.000000e+00> : vector<16xf32>
    %282 = vector.multi_reduction <add>, %279, %cst_114 [1] : vector<16x32xf32> to vector<16xf32>
    %283 = vector.shape_cast %282 : vector<16xf32> to vector<16x1xf32>
    %cst_115 = arith.constant 3.200000e+01 : f32
    %284 = vector.broadcast %cst_115 : f32 to vector<16x1xf32>
    %285 = arith.divf %283, %284 : vector<16x1xf32>
    %286 = arith.mulf %279, %279 : vector<16x32xf32>
    %cst_116 = arith.constant dense<0.000000e+00> : vector<16xf32>
    %287 = vector.multi_reduction <add>, %286, %cst_116 [1] : vector<16x32xf32> to vector<16xf32>
    %288 = vector.shape_cast %287 : vector<16xf32> to vector<16x1xf32>
    %cst_117 = arith.constant 3.200000e+01 : f32
    %289 = vector.broadcast %cst_117 : f32 to vector<16x1xf32>
    %290 = arith.divf %288, %289 : vector<16x1xf32>
    %291 = arith.mulf %285, %285 : vector<16x1xf32>
    %292 = arith.subf %290, %291 : vector<16x1xf32>
    %293 = vector.broadcast %285 : vector<16x1xf32> to vector<16x32xf32>
    %294 = arith.subf %279, %293 : vector<16x32xf32>
    %cst_118 = arith.constant 9.99999974E-6 : f32
    %295 = vector.broadcast %cst_118 : f32 to vector<16x1xf32>
    %296 = arith.addf %292, %295 : vector<16x1xf32>
    %297 = math.rsqrt %296 : vector<16x1xf32>
    %298 = vector.broadcast %297 : vector<16x1xf32> to vector<16x32xf32>
    %299 = arith.mulf %294, %298 : vector<16x32xf32>
    %300 = vector.broadcast %280 : vector<1x32xf32> to vector<16x32xf32>
    %301 = arith.mulf %299, %300 : vector<16x32xf32>
    %302 = vector.broadcast %281 : vector<1x32xf32> to vector<16x32xf32>
    %303 = arith.addf %301, %302 : vector<16x32xf32>
    %c0_119 = arith.constant 0 : index
    %c0_120 = arith.constant 0 : index
    %304 = vector.load %arg16[%c0_119, %c0_120] : memref<32x128xf32, #tpu.memory_space<vmem>>, vector<32x128xf32>
    %cst_121 = arith.constant dense<0.000000e+00> : vector<16x128xf32>
    %305 = tpu.matmul %303, %304, %cst_121 {dimension_numbers = #tpu.dot_dimension_numbers<[1], [0], [0], [1], [0, 0, 1, 1], [], []>} : vector<16x32xf32>, vector<32x128xf32>, vector<16x128xf32> -> vector<16x128xf32>
    %c0_122 = arith.constant 0 : index
    %c0_123 = arith.constant 0 : index
    %306 = vector.load %arg17[%c0_122, %c0_123] : memref<1x128xf32, #tpu.memory_space<vmem>>, vector<1x128xf32>
    %307 = vector.broadcast %306 : vector<1x128xf32> to vector<16x128xf32>
    %308 = arith.addf %305, %307 : vector<16x128xf32>
    %c0_124 = arith.constant 0 : index
    %c0_125 = arith.constant 0 : index
    %309 = vector.load %arg18[%c0_124, %c0_125] : memref<16x128xf32, #tpu.memory_space<vmem>>, vector<16x128xf32>
    tpu.vector_store %arg18[%c0_124, %c0_125], %308 {strides = array<i32>} : memref<16x128xf32, #tpu.memory_space<vmem>>, vector<16x128xf32>,
    return
  }
}

</mosaic_0001>

<bundles_post_ra>
// kernel: bigram_forward.1
= control target key start
LH: loop header
LB: loop body
LE: loop exit
PB: predicated region body
PF: predicated region fallthrough
CT: control target
= control target key end

     0   :  { %s5705_s0 = inlined_call_operand.vmem [shape: s32[16,1], index: 0, kind: input, shape index: {}]   ;;  %s5706_s1 = inlined_call_operand.vmem [shape: f32[64,32], index: 1, kind: input, shape index: {}]   ;;  %s5707_s2 = inlined_call_operand.vmem [shape: f32[8,32], index: 2, kind: input, shape index: {}]   ;;  %s5708_s3 = inlined_call_operand.vmem [shape: f32[2,1,32], index: 3, kind: input, shape index: {}]   ;;  %s5709_s4 = inlined_call_operand.vmem [shape: f32[2,1,32], index: 4, kind: input, shape index: {}]   ;;  %s5710_s5 = inlined_call_operand.vmem [shape: f32[2,32,96], index: 5, kind: input, shape index: {}]   ;;  %s5711_s6 = inlined_call_operand.vmem [shape: f32[2,32,32], index: 6, kind: input, shape index: {}]   ;;  %s5712_s7 = inlined_call_operand.vmem [shape: f32[2,1,32], index: 7, kind: input, shape index: {}]   ;;  %s5713_s8 = inlined_call_operand.vmem [shape: f32[2,1,32], index: 8, kind: input, shape index: {}]   ;;  %s5714_s9 = inlined_call_operand.vmem [shape: f32[2,1,32], index: 9, kind: input, shape index: {}]   ;;  %s5715_s10 = inlined_call_operand.vmem [shape: f32[2,32,128], index: 10, kind: input, shape index: {}]   ;;  %s5716_s11 = inlined_call_operand.vmem [shape: f32[2,1,128], index: 11, kind: input, shape index: {}]   ;;  %s5717_s12 = inlined_call_operand.vmem [shape: f32[2,128,32], index: 12, kind: input, shape index: {}]   ;;  %s5718_s13 = inlined_call_operand.vmem [shape: f32[2,1,32], index: 13, kind: input, shape index: {}]   ;;  %s5719_s14 = inlined_call_operand.vmem [shape: f32[1,32], index: 14, kind: input, shape index: {}]   ;;  %s5720_s15 = inlined_call_operand.vmem [shape: f32[1,32], index: 15, kind: input, shape index: {}]   ;;  %s5721_s16 = inlined_call_operand.vmem [shape: f32[32,128], index: 16, kind: input, shape index: {}]   ;;  %s5722_s17 = inlined_call_operand.vmem [shape: f32[1,128], index: 17, kind: input, shape index: {}]   ;;  %s5723_s18 = inlined_call_operand.hbm [shape: f32[16,128], index: 18, kind: output, shape index: {}]  }
   0x1   :  { %5731 = sst [smem:[#allocation5_spill]] %s5705_s0 }
   0x2   :  { %5732 = sst [smem:[#allocation6_spill]] %s5706_s1 }
   0x3   :  { %5733 = sst [smem:[#allocation7_spill]] %s5707_s2 }
   0x4   :  { %5734 = sst [smem:[#allocation8_spill]] %s5718_s13 }
   0x5   :  { %s5735_s29 = sld [smem:[#allocation5_spill]]  ;;  %s5736_s13 = sld [smem:[#allocation6_spill]]  ;;  %v4842_v2 = vmov 0   ;;  %v4843_v11 = vmov 0.0  }
   0x6   :  { %4733 = vset.pattern.permute.xlu0 %v4842_v2  ;;  %4287 = vmatprep.subr.mxu0 %v4843_v11 }
   0xb   :  { %v60_v0 = vld [vmem:[%s5735_s29] sm:$0xff]  ;;  %v77_v3 = vld [vmem:[%s5736_s13 + $0x8] sm:$0xff]  ;;  %v78_v4 = vld [vmem:[%s5736_s13 + $0x10] sm:$0xff] }
   0xc   :  { %v76_v1 = vld [vmem:[%s5736_s13] sm:$0xff]  ;;  %v79_v5 = vld [vmem:[%s5736_s13 + $0x18] sm:$0xff]  ;;  %65 = vperm.xlu0 %4733, %v60_v0   ;;  %v61_v6 = vld [vmem:[%s5735_s29 + $0x8] sm:$0xff] }
   0xd   :  { %v4583_v7 = vpack.c.bf16 %v77_v3, %v76_v1  ;;  %v4587_v8 = vpack.c.bf16 %v79_v5, %v78_v4  ;;  %v80_v9 = vld [vmem:[%s5736_s13 + $0x20] sm:$0xff]  ;;  %v81_v10 = vld [vmem:[%s5736_s13 + $0x28] sm:$0xff] }
   0xe   :  { %23 = vsyncpa [#allocation3], 0  ;;  %v4591_v12 = vpack.c.bf16 %v81_v10, %v80_v9  ;;  %v82_v13 = vld [vmem:[%s5736_s13 + $0x30] sm:$0xff]  ;;  %v83_v14 = vld [vmem:[%s5736_s13 + $0x38] sm:$0xff]  ;;  %v62_v16 = vlaneseq  ;;  %vm85_vm0 = vcmask 523264   ;;  %s5737_s20 = sld [smem:[#allocation7_spill]] }
   0xf   :  { %4584 = vmatprep.subr.bf16.mxu1 %v4583_v7  ;;  %v4595_v15 = vpack.c.bf16 %v83_v14, %v82_v13  ;;  %vm173_vm3 = vcmask 261120   ;;  %v221_v33 = vld [vmem:[%s5710_s5] sm:$0xff]  ;;  %v222_v34 = vld [vmem:[%s5710_s5 + $0x8] sm:$0xff]  ;;  %v223_v36 = vld [vmem:[%s5710_s5 + $0x10] sm:$0xff]  ;;  %s4844_s19 = smov 120   ;;  %s4845_s13 = smov 104  }
  0x10   :  { %4586 = vmatpush3.bf16.msra.mxu1 %v4583_v7  ;;  %68 = vperm.xlu0 %4733, %v61_v6   ;;  %v4983_v17 = vand.u32 127, %v62_v16  ;;  %v4599_v35 = vpack.c.bf16 %v222_v34, %v221_v33  ;;  %v224_v37 = vld [vmem:[%s5710_s5 + $0x18] sm:$0xff]  ;;  %v3991_v55 = vld [vmem:[%s5708_s3] ss:$0 sm:$0xff]  ;;  %s4846_s1 = smov 112   ;;  %vm4847_vm4 = vmmov 0  }
  0x11   :  { %4588 = vmatprep.subr.bf16.mxu1 %v4587_v8  ;;  %v4603_v38 = vpack.c.bf16 %v224_v37, %v223_v36  ;;  %v3992_v59 = vld [vmem:[%s5709_s4] ss:$0 sm:$0xff]  ;;  %4289 = vmatprep.mubr.msk.f32.mxu0 %vm4847_vm4, %v4843_v11  ;;  %vm322_vm5 = vcmask 64512   ;;  %s4850_s21 = smov 64   ;;  %s4851_s29 = smov 8   ;;  %vm1651_vm7 = vcmask 130048  }
  0x12   :  { %s5729_s30 = smov 16   ;;  %s5727_s0 = smov 24   ;;  %vm1654_vm8 = vcmask 195584  }
  0x13   :  { %s5738_s23 = sld [smem:[#allocation8_spill]]  ;;  %s5739_s27 = smov 16  }
  0x14   :  { %4590 = vmatpush3.bf16.msra.mxu1 %v4587_v8  ;;  %v84_v22 = vld [vmem:[%s5737_s20] sm:$0xff]  ;;  %s4848_s20 = smov 96   ;;  %s5740_s28 = smov 24  }
  0x15   :  { %4592 = vmatprep.subr.bf16.mxu1 %v4591_v12 }
  0x18   :  { %4594 = vmatpush3.bf16.msra.mxu1 %v4591_v12 }
  0x19   :  { %4596 = vmatprep.subr.bf16.mxu1 %v4595_v15 }
  0x1c   :  { %4598 = vmatpush3.bf16.msra.mxu1 %v4595_v15 }
  0x1d   :  { %4600 = vmatprep.subr.bf16.mxu1 %v4599_v35 }
  0x8b   :  { %v66_v18 = vpop.permute.xlu0 %65 }
  0x8c   :  { %vm70_vm1 = vcmp.eq.s32.totalorder %v4983_v17, %v66_v18 }
  0x8d   :  { %v3987_v19 = vsel %vm70_vm1, 1.0, %v4843_v11 }
  0x8e   :  { %4273 = vmatprep.mubr.msk.f32.mxu1 %vm85_vm0, %v3987_v19 }
  0x8f   :  { %v69_v20 = vpop.permute.xlu0 %68 }
  0x90   :  { %vm71_vm2 = vcmp.eq.s32.totalorder %v4983_v17, %v69_v20  ;;  %v168_v20 = vshrl.u32 %v62_v16, 7 }
  0x91   :  { %v3988_v21 = vsel %vm71_vm2, 1.0, %v4843_v11 }
  0x92   :  { %4274 = vmatmul.mubr.msk.f32.vlgmr.msra.gmra.mrb[0].mxu1 %vm85_vm0, %v3988_v21  ;;  %vm169_vm6 = vcmp.le.s32.totalorder %v4983_v17, %v168_v20  ;;  %v4849_v21 = vmov -1e+30  }
  0x93   :  { %4602 = vmatpush3.bf16.msra.mxu1 %v4599_v35 }
  0x94   :  { %4604 = vmatprep.subr.bf16.mxu1 %v4603_v38 }
  0x97   :  { %4606 = vmatpush3.bf16.msra.mxu1 %v4603_v38 }
  0x98   :  { %4292 = vmatprep.subr.mxu1 %v4843_v11 }
 0x165   :  { %v4275_v23 = vpop.f32.mrb[0].mxu1 }
 0x166   :  { %v4992_v24 = vadd.f32 %v4275_v23, %v84_v22  ;;  %v158_v25 = vpop.f32.mrb[1].mxu1 }
 0x167   :  { %v4994_v26 = vadd.f32 %v158_v25, %v84_v22  ;;  %v5127_v22 = vsel %vm169_vm6, 0.0, %v4849_v21 }
 0x168   :  { %v177_v27 = vsel %vm173_vm3, %v4992_v24, 0.0  ;;  %v184_v31 = vmul.f32 %v4992_v24, %v4992_v24 }
 0x169   :  { %178 = vadd.xlane.f32.xlu1 %v177_v27  ;;  %v183_v28 = vmul.f32 %v4994_v26, %v4994_v26  ;;  %v174_v30 = vsel %vm173_vm3, %v4994_v26, 0.0 }
 0x16a   :  { %v188_v32 = vsel %vm173_vm3, %v184_v31, 0.0 }
 0x16b   :  { %v185_v29 = vsel %vm173_vm3, %v183_v28, 0.0 }
 0x16c   :  { %186 = vadd.xlane.f32.xlu0 %v185_v29 }
 0x16d   :  { %175 = vadd.xlane.f32.xlu1 %v174_v30 }
 0x171   :  { %189 = vadd.xlane.f32.xlu1 %v188_v32 }
 0x1f6   :  { %v179_v39 = vpop.xlane.xlu1 %178 }
 0x1f7   :  { %v182_v42 = vmul.f32 0.03125, %v179_v39 }
 0x1f9   :  { %v187_v40 = vpop.xlane.xlu0 %186  ;;  %v194_v47 = vmul.f32 %v182_v42, %v182_v42  ;;  %v198_v56 = vsub.f32 %v4992_v24, %v182_v42 }
 0x1fa   :  { %v176_v41 = vpop.xlane.xlu1 %175  ;;  %v191_v44 = vmul.f32 0.03125, %v187_v40 }
 0x1fb   :  { %v181_v43 = vmul.f32 0.03125, %v176_v41 }
 0x1fd   :  { %v193_v45 = vmul.f32 %v181_v43, %v181_v43  ;;  %v197_v53 = vsub.f32 %v4994_v26, %v181_v43 }
 0x1fe   :  { %v190_v46 = vpop.xlane.xlu1 %189 }
 0x1ff   :  { %v195_v48 = vsub.f32 %v191_v44, %v193_v45  ;;  %v192_v49 = vmul.f32 0.03125, %v190_v46 }
 0x201   :  { %v199_v50 = vadd.f32 1e-05, %v195_v48  ;;  %v196_v51 = vsub.f32 %v192_v49, %v194_v47 }
 0x203   :  { %4734 = vrsqrt.f32 %v199_v50  ;;  %v200_v52 = vadd.f32 1e-05, %v196_v51 }
 0x205   :  { %4736 = vrsqrt.f32 %v200_v52 }
 0x20d   :  { %v4735_v54 = vpop.eup %4734 }
 0x20e   :  { %v203_v57 = vmul.f32 %v4735_v54, %v197_v53 }
 0x20f   :  { %v4737_v58 = vpop.eup %4736 }
 0x210   :  { %v211_v60 = vmul.f32 %v3991_v55, %v203_v57  ;;  %v204_v61 = vmul.f32 %v4737_v58, %v198_v56 }
 0x212   :  { %v212_v62 = vmul.f32 %v3991_v55, %v204_v61  ;;  %v219_v63 = vadd.f32 %v3992_v59, %v211_v60 }
 0x214   :  { %v220_v0 = vadd.f32 %v3992_v59, %v212_v62  ;;  %4284 = vmatprep.mubr.msk.f32.mxu1 %vm173_vm3, %v219_v63 }
 0x216   :  { %4285 = vmatmul.mubr.msk.f32.vlgmr.msra.gmra.mrb[2].mxu1 %vm173_vm3, %v220_v0 }
 0x217   :  { %4294 = vmatprep.mubr.msk.f32.mxu1 %vm4847_vm4, %v4843_v11 }
 0x2e9   :  { %v5029_v1 = vpop.f32.mrb[2].mxu1 }
 0x2ea   :  { %310 = vrot.lane.b32.xlu1 %v5029_v1, %s4844_s19  ;;  %v5033_v2 = vpop.f32.mrb[3].mxu1 }
 0x2eb   :  { %316 = vrot.lane.b32.xlu0 %v5033_v2, %s4845_s13 }
 0x2ee   :  { %308 = vrot.lane.b32.xlu1 %v5033_v2, %s4844_s19 }
 0x2f2   :  { %312 = vrot.lane.b32.xlu1 %v5033_v2, %s4846_s1 }
 0x2f6   :  { %314 = vrot.lane.b32.xlu1 %v5029_v1, %s4846_s1 }
 0x2fa   :  { %318 = vrot.lane.b32.xlu1 %v5029_v1, %s4845_s13 }
 0x2fe   :  { %397 = vrot.lane.b32.xlu1 %v5029_v1, %s4848_s20 }
 0x302   :  { %320 = vrot.lane.b32.xlu1 %v5033_v2, %s4848_s20 }
 0x35c   :  { %v5053_v3 = vpop.permute.xlu1 %310 }
 0x35d   :  { %v5065_v6 = vpop.permute.xlu0 %316 }
 0x360   :  { %v5055_v4 = vpop.permute.xlu1 %308 }
 0x361   :  { %473 = vrot.lane.b32.xlu1 %v5055_v4, %s4848_s20 }
 0x364   :  { %v5059_v5 = vpop.permute.xlu1 %312 }
 0x365   :  { %549 = vrot.lane.b32.xlu1 %v5053_v3, %s4848_s20  ;;  %625 = vrot.lane.b32.xlu0 %v5059_v5, %s4848_s20 }
 0x368   :  { %v5067_v7 = vpop.permute.xlu1 %314 }
 0x369   :  { %777 = vrot.lane.b32.xlu0 %v5065_v6, %s4848_s20  ;;  %701 = vrot.lane.b32.xlu1 %v5067_v7, %s4848_s20 }
 0x36c   :  { %v5073_v8 = vpop.permute.xlu1 %318 }
 0x36d   :  { %853 = vrot.lane.b32.xlu1 %v5073_v8, %s4848_s20 }
 0x370   :  { %v398_v9 = vpop.permute.xlu1 %397 }
 0x371   :  { %4293 = vmatpush3.xpose.msk.msra.mxu1 %vm322_vm5, %v398_v9 }
 0x372   :  { %4302 = vmatprep.subr.mxu1 %v4843_v11 }
 0x374   :  { %4295 = vmatmul.mubr.msk.f32.vlgmr.msra.gmra.mrb[4].mxu1 %vm322_vm5, %v5029_v1  ;;  %v321_v10 = vpop.permute.xlu1 %320 }
 0x375   :  { %4288 = vmatpush3.xpose.msk.msra.mxu0 %vm322_vm5, %v321_v10  ;;  %4304 = vmatprep.mubr.msk.f32.mxu1 %vm4847_vm4, %v4843_v11 }
 0x376   :  { %4297 = vmatprep.subr.mxu0 %v4843_v11 }
 0x378   :  { %4290 = vmatmul.mubr.msk.f32.vlgmr.msra.gmra.mrb[0].mxu0 %vm322_vm5, %v5033_v2 }
 0x379   :  { %4299 = vmatprep.mubr.msk.f32.mxu0 %vm4847_vm4, %v4843_v11 }
 0x3d3   :  { %v474_v12 = vpop.permute.xlu1 %473 }
 0x3d4   :  { %4298 = vmatpush3.xpose.msk.msra.mxu0 %vm322_vm5, %v474_v12 }
 0x3d5   :  { %4307 = vmatprep.subr.mxu0 %v4843_v11 }
 0x3d7   :  { %v626_v13 = vpop.permute.xlu0 %625  ;;  %4300 = vmatmul.mubr.msk.f32.vlgmr.msra.gmra.mrb[2].mxu0 %vm322_vm5, %v5055_v4  ;;  %v550_v14 = vpop.permute.xlu1 %549 }
 0x3d8   :  { %4303 = vmatpush3.xpose.msk.msra.mxu1 %vm322_vm5, %v550_v14  ;;  %4308 = vmatpush3.xpose.msk.msra.mxu0 %vm322_vm5, %v626_v13 }
 0x3d9   :  { %4309 = vmatprep.mubr.msk.f32.mxu0 %vm4847_vm4, %v4843_v11  ;;  %4312 = vmatprep.subr.mxu1 %v4843_v11 }
 0x3da   :  { %4317 = vmatprep.subr.mxu0 %v4843_v11 }
 0x3db   :  { %v778_v15 = vpop.permute.xlu0 %777  ;;  %4305 = vmatmul.mubr.msk.f32.vlgmr.msra.gmra.mrb[6].mxu1 %vm322_vm5, %v5053_v3  ;;  %4310 = vmatmul.mubr.msk.f32.vlgmr.msra.gmra.mrb[4].mxu0 %vm322_vm5, %v5059_v5  ;;  %v702_v18 = vpop.permute.xlu1 %701 }
 0x3dc   :  { %4313 = vmatpush3.xpose.msk.msra.mxu1 %vm322_vm5, %v702_v18  ;;  %4318 = vmatpush3.xpose.msk.msra.mxu0 %vm322_vm5, %v778_v15 }
 0x3dd   :  { %4314 = vmatprep.mubr.msk.f32.mxu1 %vm4847_vm4, %v4843_v11  ;;  %4319 = vmatprep.mubr.msk.f32.mxu0 %vm4847_vm4, %v4843_v11 }
 0x3de   :  { %4322 = vmatprep.subr.mxu1 %v4843_v11  ;;  %4327 = vmatprep.subr.mxu0 %v4843_v11 }
 0x3df   :  { %4315 = vmatmul.mubr.msk.f32.vlgmr.msra.gmra.mrb[8].mxu1 %vm322_vm5, %v5067_v7  ;;  %4320 = vmatmul.mubr.msk.f32.vlgmr.msra.gmra.mrb[6].mxu0 %vm322_vm5, %v5065_v6  ;;  %v854_v19 = vpop.permute.xlu1 %853 }
 0x3e0   :  { %4323 = vmatpush3.xpose.msk.msra.mxu1 %vm322_vm5, %v854_v19  ;;  %4324 = vmatprep.mubr.msk.f32.mxu1 %vm4847_vm4, %v4843_v11 }
 0x3e1   :  { %4332 = vmatprep.subr.mxu1 %v4843_v11  ;;  %4329 = vmatprep.mubr.msk.f32.mxu0 %vm4847_vm4, %v4843_v11 }
 0x3e3   :  { %4325 = vmatmul.mubr.msk.f32.vlgmr.msra.gmra.mrb[10].mxu1 %vm322_vm5, %v5073_v8 }
 0x3e4   :  { %4334 = vmatprep.mubr.msk.f32.mxu1 %vm4847_vm4, %v4843_v11 }
 0x447   :  { %v469_v23 = vpop.f32.mrb[4].mxu1 }
 0x448   :  { %v470_v25 = vadd.f32 %v469_v23, %v5127_v22  ;;  %v4296_v27 = vpop.f32.mrb[5].mxu1 }
 0x44a   :  { %v932_v28 = vsel %vm322_vm5, %v470_v25, -inf }
 0x44b   :  { %933 = vmax.xlane.f32.xlu1 %v932_v28  ;;  %v393_v29 = vpop.f32.mrb[0].mxu0 }
 0x44c   :  { %v394_v30 = vadd.f32 %v393_v29, %v5127_v22  ;;  %v4291_v31 = vpop.f32.mrb[1].mxu0 }
 0x44e   :  { %v929_v32 = vsel %vm322_vm5, %v394_v30, -inf }
 0x44f   :  { %930 = vmax.xlane.f32.xlu0 %v929_v32 }
 0x4aa   :  { %v545_v16 = vpop.f32.mrb[2].mxu0 }
 0x4ab   :  { %v546_v17 = vadd.f32 %v545_v16, %v5127_v22  ;;  %v4301_v33 = vpop.f32.mrb[3].mxu0 }
 0x4ad   :  { %v935_v34 = vsel %vm322_vm5, %v546_v17, -inf }
 0x4ae   :  { %936 = vmax.xlane.f32.xlu0 %v935_v34  ;;  %v621_v35 = vpop.f32.mrb[6].mxu1  ;;  %v697_v36 = vpop.f32.mrb[4].mxu0 }
 0x4af   :  { %v622_v37 = vadd.f32 %v621_v35, %v5127_v22  ;;  %v698_v38 = vadd.f32 %v697_v36, %v5127_v22  ;;  %v4306_v39 = vpop.f32.mrb[7].mxu1  ;;  %v4311_v40 = vpop.f32.mrb[5].mxu0 }
 0x4b1   :  { %v941_v41 = vsel %vm322_vm5, %v698_v38, -inf  ;;  %v938_v42 = vsel %vm322_vm5, %v622_v37, -inf }
 0x4b2   :  { %942 = vmax.xlane.f32.xlu1 %v941_v41  ;;  %v849_v43 = vpop.f32.mrb[6].mxu0  ;;  %939 = vmax.xlane.f32.xlu0 %v938_v42  ;;  %v773_v44 = vpop.f32.mrb[8].mxu1 }
 0x4b3   :  { %v850_v45 = vadd.f32 %v849_v43, %v5127_v22  ;;  %v774_v46 = vadd.f32 %v773_v44, %v5127_v22  ;;  %v4316_v47 = vpop.f32.mrb[9].mxu1  ;;  %v4321_v48 = vpop.f32.mrb[7].mxu0 }
 0x4b5   :  { %v947_v49 = vsel %vm322_vm5, %v850_v45, -inf  ;;  %v944_v50 = vsel %vm322_vm5, %v774_v46, -inf }
 0x4b6   :  { %948 = vmax.xlane.f32.xlu1 %v947_v49  ;;  %945 = vmax.xlane.f32.xlu0 %v944_v50  ;;  %v925_v51 = vpop.f32.mrb[10].mxu1 }
 0x4b7   :  { %v926_v52 = vadd.f32 %v925_v51, %v5127_v22  ;;  %v4326_v53 = vpop.f32.mrb[11].mxu1 }
 0x4b9   :  { %v950_v54 = vsel %vm322_vm5, %v926_v52, -inf }
 0x4ba   :  { %951 = vmax.xlane.f32.xlu0 %v950_v54 }
 0x4c7   :  { %1017 = vrot.lane.b32.xlu1 %v5033_v2, %s4850_s21 }
 0x4cb   :  { %1169 = vrot.lane.b32.xlu1 %v5055_v4, %s4850_s21 }
 0x4cf   :  { %1245 = vrot.lane.b32.xlu1 %v5053_v3, %s4850_s21 }
 0x4d0   :  { %1093 = vrot.lane.b32.xlu0 %v5029_v1, %s4850_s21 }
 0x4d3   :  { %1397 = vrot.lane.b32.xlu1 %v5067_v7, %s4850_s21 }
 0x4d4   :  { %1321 = vrot.lane.b32.xlu0 %v5059_v5, %s4850_s21 }
 0x4d8   :  { %v934_v55 = vpop.xlane.xlu1 %933 }
 0x4d9   :  { %v954_v56 = vsub.f32 %v470_v25, %v934_v55 }
 0x4db   :  { %v963_v58 = vmul.f32 1.442695, %v954_v56 }
 0x4dc   :  { %v931_v57 = vpop.xlane.xlu0 %930 }
 0x4dd   :  { %v953_v59 = vsub.f32 %v394_v30, %v931_v57  ;;  %4738 = vpow2.f32 %v963_v58 }
 0x4df   :  { %v961_v60 = vmul.f32 1.442695, %v953_v59 }
 0x4e1   :  { %4740 = vpow2.f32 %v961_v60 }
 0x4e7   :  { %v5157_v61 = vpop.eup %4738 }
 0x4e8   :  { %v980_v62 = vsel %vm322_vm5, %v5157_v61, 0.0 }
 0x4eb   :  { %v5161_v63 = vpop.eup %4740 }
 0x4ec   :  { %v977_v0 = vsel %vm322_vm5, %v5161_v63, 0.0 }
 0x4f3   :  { %981 = vadd.xlane.f32.xlu0 %v980_v62 }
 0x4f7   :  { %978 = vadd.xlane.f32.xlu1 %v977_v0 }
 0x53b   :  { %v937_v1 = vpop.xlane.xlu0 %936 }
 0x53c   :  { %v955_v2 = vsub.f32 %v546_v17, %v937_v1 }
 0x53e   :  { %v965_v3 = vmul.f32 1.442695, %v955_v2 }
 0x53f   :  { %v940_v4 = vpop.xlane.xlu0 %939  ;;  %v943_v5 = vpop.xlane.xlu1 %942 }
 0x540   :  { %4742 = vpow2.f32 %v965_v3  ;;  %v956_v7 = vsub.f32 %v622_v37, %v940_v4  ;;  %v957_v9 = vsub.f32 %v698_v38, %v943_v5 }
 0x542   :  { %v967_v10 = vmul.f32 1.442695, %v956_v7  ;;  %v969_v12 = vmul.f32 1.442695, %v957_v9  ;;  %v1657_v9 = vld [vmem:[%s5711_s6] sm:$0xff] }
 0x543   :  { %v946_v13 = vpop.xlane.xlu0 %945  ;;  %v949_v14 = vpop.xlane.xlu1 %948 }
 0x544   :  { %4744 = vpow2.f32 %v967_v10  ;;  %v958_v15 = vsub.f32 %v774_v46, %v946_v13  ;;  %v959_v18 = vsub.f32 %v850_v45, %v949_v14  ;;  %v1658_v10 = vld [vmem:[%s5711_s6 + $0x8] sm:$0xff]  ;;  %v1659_v13 = vld [vmem:[%s5711_s6 + $0x10] sm:$0xff]  ;;  %v1660_v14 = vld [vmem:[%s5711_s6 + $0x18] sm:$0xff] }
 0x545   :  { %4746 = vpow2.f32 %v969_v12  ;;  %v4607_v12 = vpack.c.bf16 %v1658_v10, %v1657_v9  ;;  %v1904_v9 = vld [vmem:[%s5717_s12 + $0x48] sm:$0xff] }
 0x546   :  { %v971_v19 = vmul.f32 1.442695, %v958_v15  ;;  %v973_v20 = vmul.f32 1.442695, %v959_v18  ;;  %v4611_v15 = vpack.c.bf16 %v1660_v14, %v1659_v13  ;;  %v1906_v13 = vld [vmem:[%s5717_s12 + $0x58] sm:$0xff] }
 0x547   :  { %v952_v21 = vpop.xlane.xlu0 %951  ;;  %v1018_v23 = vpop.permute.xlu1 %1017 }
 0x548   :  { %4748 = vpow2.f32 %v971_v19  ;;  %v960_v25 = vsub.f32 %v926_v52, %v952_v21  ;;  %4328 = vmatpush3.msra.mxu0 %v1018_v23 }
 0x549   :  { %4750 = vpow2.f32 %v973_v20  ;;  %4337 = vmatprep.subr.mxu0 %v4843_v11 }
 0x54a   :  { %v4743_v27 = vpop.eup %4742  ;;  %v975_v28 = vmul.f32 1.442695, %v960_v25 }
 0x54b   :  { %v1094_v29 = vpop.permute.xlu0 %1093  ;;  %v983_v30 = vsel %vm322_vm5, %v4743_v27, 0.0  ;;  %v1170_v39 = vpop.permute.xlu1 %1169 }
 0x54c   :  { %4752 = vpow2.f32 %v975_v28  ;;  %984 = vadd.xlane.f32.xlu1 %v983_v30  ;;  %4333 = vmatpush3.msra.mxu1 %v1094_v29 }
 0x54d   :  { %4342 = vmatprep.subr.mxu1 %v4843_v11 }
 0x54e   :  { %v4745_v31 = vpop.eup %4744 }
 0x54f   :  { %v4747_v32 = vpop.eup %4746  ;;  %v986_v16 = vsel %vm322_vm5, %v4745_v31, 0.0  ;;  %v1246_v40 = vpop.permute.xlu1 %1245 }
 0x550   :  { %987 = vadd.xlane.f32.xlu0 %v986_v16  ;;  %v989_v17 = vsel %vm322_vm5, %v4747_v32, 0.0  ;;  %v1322_v41 = vpop.permute.xlu0 %1321 }
 0x551   :  { %990 = vadd.xlane.f32.xlu1 %v989_v17 }
 0x552   :  { %v4749_v33 = vpop.eup %4748 }
 0x553   :  { %v4751_v34 = vpop.eup %4750  ;;  %v992_v35 = vsel %vm322_vm5, %v4749_v33, 0.0  ;;  %v1398_v42 = vpop.permute.xlu1 %1397 }
 0x554   :  { %993 = vadd.xlane.f32.xlu0 %v992_v35  ;;  %v995_v36 = vsel %vm322_vm5, %v4751_v34, 0.0 }
 0x555   :  { %996 = vadd.xlane.f32.xlu1 %v995_v36 }
 0x556   :  { %v5172_v37 = vpop.eup %4752 }
 0x557   :  { %v998_v38 = vsel %vm322_vm5, %v5172_v37, 0.0 }
 0x558   :  { %999 = vadd.xlane.f32.xlu0 %v998_v38 }
 0x566   :  { %1549 = vrot.lane.b32.xlu1 %v5073_v8, %s4850_s21 }
 0x56e   :  { %1473 = vrot.lane.b32.xlu0 %v5065_v6, %s4850_s21 }
 0x580   :  { %v982_v43 = vpop.xlane.xlu0 %981 }
 0x581   :  { %4754 = vrcp.f32 %v982_v43 }
 0x584   :  { %v979_v44 = vpop.xlane.xlu1 %978 }
 0x585   :  { %4756 = vrcp.f32 %v979_v44  ;;  %v4021_v44 = vld [vmem:[%s5712_s7] ss:$0 sm:$0xff] }
 0x58b   :  { %v4755_v45 = vpop.eup %4754 }
 0x58c   :  { %v1010_v46 = vmul.f32 %v4755_v45, %v5157_v61 }
 0x58e   :  { %4335 = vmatmul.mubr.msk.f32.vlgmr.msra.gmra.mrb[12].mxu1 %vm322_vm5, %v1010_v46 }
 0x58f   :  { %v4757_v47 = vpop.eup %4756  ;;  %4343 = vmatpush3.msra.mxu1 %v1246_v40  ;;  %4344 = vmatprep.mubr.msk.f32.mxu1 %vm4847_vm4, %v4843_v11 }
 0x590   :  { %v1009_v6 = vmul.f32 %v4757_v47, %v5161_v63  ;;  %4352 = vmatprep.subr.mxu1 %v4843_v11 }
 0x592   :  { %4330 = vmatmul.mubr.msk.f32.vlgmr.msra.gmra.mrb[8].mxu0 %vm322_vm5, %v1009_v6 }
 0x593   :  { %4338 = vmatpush3.msra.mxu0 %v1170_v39  ;;  %4339 = vmatprep.mubr.msk.f32.mxu0 %vm4847_vm4, %v4843_v11 }
 0x594   :  { %4347 = vmatprep.subr.mxu0 %v4843_v11 }
 0x5d9   :  { %v985_v8 = vpop.xlane.xlu1 %984 }
 0x5da   :  { %4758 = vrcp.f32 %v985_v8 }
 0x5dd   :  { %v988_v48 = vpop.xlane.xlu0 %987 }
 0x5de   :  { %4760 = vrcp.f32 %v988_v48  ;;  %v991_v49 = vpop.xlane.xlu1 %990 }
 0x5df   :  { %4762 = vrcp.f32 %v991_v49 }
 0x5e1   :  { %v994_v50 = vpop.xlane.xlu0 %993 }
 0x5e2   :  { %4764 = vrcp.f32 %v994_v50  ;;  %v997_v51 = vpop.xlane.xlu1 %996 }
 0x5e3   :  { %4766 = vrcp.f32 %v997_v51 }
 0x5e4   :  { %v4759_v52 = vpop.eup %4758 }
 0x5e5   :  { %v1011_v53 = vmul.f32 %v4759_v52, %v4743_v27  ;;  %v1000_v54 = vpop.xlane.xlu0 %999  ;;  %v1801_v52 = vld [vmem:[%s5715_s10] sm:$0xff] }
 0x5e6   :  { %4768 = vrcp.f32 %v1000_v54  ;;  %v1550_v0 = vpop.permute.xlu1 %1549  ;;  %v1803_v54 = vld [vmem:[%s5715_s10 + $0x10] sm:$0xff] }
 0x5e7   :  { %4340 = vmatmul.mubr.msk.f32.vlgmr.msra.gmra.mrb[10].mxu0 %vm322_vm5, %v1011_v53  ;;  %v1802_v53 = vld [vmem:[%s5715_s10 + $0x8] sm:$0xff] }
 0x5e8   :  { %v4761_v55 = vpop.eup %4760  ;;  %4348 = vmatpush3.msra.mxu0 %v1322_v41  ;;  %4349 = vmatprep.mubr.msk.f32.mxu0 %vm4847_vm4, %v4843_v11 }
 0x5e9   :  { %v4763_v56 = vpop.eup %4762  ;;  %v1012_v57 = vmul.f32 %v4761_v55, %v4745_v31  ;;  %4357 = vmatprep.subr.mxu0 %v4843_v11  ;;  %v1474_v59 = vpop.permute.xlu0 %1473  ;;  %v4615_v55 = vpack.c.bf16 %v1802_v53, %v1801_v52 }
 0x5ea   :  { %v1013_v58 = vmul.f32 %v4763_v56, %v4747_v32  ;;  %v1804_v56 = vld [vmem:[%s5715_s10 + $0x18] sm:$0xff] }
 0x5eb   :  { %4345 = vmatmul.mubr.msk.f32.vlgmr.msra.gmra.mrb[14].mxu1 %vm322_vm5, %v1012_v57  ;;  %v4619_v57 = vpack.c.bf16 %v1804_v56, %v1803_v54  ;;  %v4027_v56 = vld [vmem:[%s5738_s23] ss:$0 sm:$0xff] }
 0x5ec   :  { %v4765_v60 = vpop.eup %4764  ;;  %4350 = vmatmul.mubr.msk.f32.vlgmr.msra.gmra.mrb[12].mxu0 %vm322_vm5, %v1013_v58  ;;  %4353 = vmatpush3.msra.mxu1 %v1398_v42  ;;  %v1895_v58 = vld [vmem:[%s5717_s12] sm:$0xff] }
 0x5ed   :  { %v4767_v61 = vpop.eup %4766  ;;  %v1014_v62 = vmul.f32 %v4765_v60, %v4749_v33  ;;  %4358 = vmatpush3.msra.mxu0 %v1474_v59  ;;  %4354 = vmatprep.mubr.msk.f32.mxu1 %vm4847_vm4, %v4843_v11  ;;  %v1896_v59 = vld [vmem:[%s5717_s12 + $0x8] sm:$0xff]  ;;  %v1897_v60 = vld [vmem:[%s5717_s12 + $0x10] sm:$0xff] }
 0x5ee   :  { %v1015_v63 = vmul.f32 %v4767_v61, %v4751_v34  ;;  %4359 = vmatprep.mubr.msk.f32.mxu0 %vm4847_vm4, %v4843_v11  ;;  %4362 = vmatprep.subr.mxu1 %v4843_v11  ;;  %v4623_v61 = vpack.c.bf16 %v1896_v59, %v1895_v58 }
 0x5ef   :  { %4355 = vmatmul.mubr.msk.f32.vlgmr.msra.gmra.mrb[16].mxu1 %vm322_vm5, %v1014_v62  ;;  %4608 = vmatprep.subr.bf16.mxu0 %v4607_v12  ;;  %v1898_v62 = vld [vmem:[%s5717_s12 + $0x18] sm:$0xff] }
 0x5f0   :  { %v4769_v1 = vpop.eup %4768  ;;  %4360 = vmatmul.mubr.msk.f32.vlgmr.msra.gmra.mrb[14].mxu0 %vm322_vm5, %v1015_v63  ;;  %4363 = vmatpush3.msra.mxu1 %v1550_v0  ;;  %v4627_v63 = vpack.c.bf16 %v1898_v62, %v1897_v60  ;;  %v1899_v0 = vld [vmem:[%s5717_s12 + $0x20] sm:$0xff] }
 0x5f1   :  { %v1016_v2 = vmul.f32 %v4769_v1, %v5172_v37  ;;  %4364 = vmatprep.mubr.msk.f32.mxu1 %vm4847_vm4, %v4843_v11  ;;  %4610 = vmatpush3.bf16.msra.mxu0 %v4607_v12  ;;  %v1900_v1 = vld [vmem:[%s5717_s12 + $0x28] sm:$0xff]  ;;  %v1905_v12 = vld [vmem:[%s5717_s12 + $0x50] sm:$0xff] }
 0x5f2   :  { %4612 = vmatprep.subr.bf16.mxu0 %v4611_v15  ;;  %4616 = vmatprep.subr.bf16.mxu1 %v4615_v55  ;;  %v4643_v14 = vpack.c.bf16 %v1906_v13, %v1905_v12 }
 0x5f3   :  { %4365 = vmatmul.mubr.msk.f32.vlgmr.msra.gmra.mrb[18].mxu1 %vm322_vm5, %v1016_v2  ;;  %v4631_v2 = vpack.c.bf16 %v1900_v1, %v1899_v0 }
 0x5f4   :  { %4618 = vmatpush3.bf16.msra.mxu1 %v4615_v55 }
 0x5f5   :  { %4614 = vmatpush3.bf16.msra.mxu0 %v4611_v15  ;;  %4620 = vmatprep.subr.bf16.mxu1 %v4619_v57  ;;  %v1907_v15 = vld [vmem:[%s5717_s12 + $0x60] sm:$0xff] }
 0x5f6   :  { %4624 = vmatprep.subr.bf16.mxu0 %v4623_v61 }
 0x5f8   :  { %4622 = vmatpush3.bf16.msra.mxu1 %v4619_v57 }
 0x661   :  { %v1165_v3 = vpop.f32.mrb[12].mxu1 }
 0x662   :  { %v4336_v4 = vpop.f32.mrb[13].mxu1 }
 0x663   :  { %v1902_v4 = vld [vmem:[%s5717_s12 + $0x38] sm:$0xff] }
 0x665   :  { %v1089_v5 = vpop.f32.mrb[8].mxu0 }
 0x666   :  { %v4331_v7 = vpop.f32.mrb[9].mxu0 }
 0x667   :  { %v1903_v7 = vld [vmem:[%s5717_s12 + $0x40] sm:$0xff] }
 0x668   :  { %v4639_v10 = vpack.c.bf16 %v1904_v9, %v1903_v7  ;;  %v4035_v7 = vld [vmem:[%s5710_s5 + $0x38] sm:$0xff] }
 0x6ba   :  { %v1241_v18 = vpop.f32.mrb[10].mxu0 }
 0x6bb   :  { %1627 = vrot.lane.b32.xlu0 %v1241_v18, %s4851_s29  ;;  %v4341_v19 = vpop.f32.mrb[11].mxu0  ;;  %v1908_v18 = vld [vmem:[%s5717_s12 + $0x68] sm:$0xff] }
 0x6bc   :  { %v4647_v19 = vpack.c.bf16 %v1908_v18, %v1907_v15 }
 0x6be   :  { %v1317_v20 = vpop.f32.mrb[14].mxu1 }
 0x6bf   :  { %v1393_v21 = vpop.f32.mrb[12].mxu0  ;;  %1629 = vrot.lane.b32.xlu1 %v1317_v20, %s4851_s29  ;;  %v4346_v23 = vpop.f32.mrb[15].mxu1 }
 0x6c0   :  { %1635 = vrot.lane.b32.xlu0 %v1393_v21, %s5729_s30  ;;  %v4351_v25 = vpop.f32.mrb[13].mxu0 }
 0x6c2   :  { %v1469_v27 = vpop.f32.mrb[16].mxu1 }
 0x6c3   :  { %v1545_v28 = vpop.f32.mrb[14].mxu0  ;;  %1637 = vrot.lane.b32.xlu1 %v1469_v27, %s5729_s30  ;;  %v4356_v29 = vpop.f32.mrb[17].mxu1 }
 0x6c4   :  { %1643 = vrot.lane.b32.xlu0 %v1545_v28, %s5727_s0  ;;  %v4361_v30 = vpop.f32.mrb[15].mxu0 }
 0x6c6   :  { %v1621_v31 = vpop.f32.mrb[18].mxu1 }
 0x6c7   :  { %1645 = vrot.lane.b32.xlu1 %v1621_v31, %s5727_s0  ;;  %v4366_v32 = vpop.f32.mrb[19].mxu1 }
 0x72d   :  { %v1628_v16 = vpop.permute.xlu0 %1627 }
 0x72e   :  { %v1649_v34 = vsel %vm322_vm5, %v1089_v5, %v1628_v16 }
 0x731   :  { %v1630_v17 = vpop.permute.xlu1 %1629 }
 0x732   :  { %v1636_v33 = vpop.permute.xlu0 %1635  ;;  %v1650_v39 = vsel %vm322_vm5, %v1165_v3, %v1630_v17  ;;  %v1901_v3 = vld [vmem:[%s5717_s12 + $0x30] sm:$0xff] }
 0x733   :  { %v1652_v36 = vsel %vm1651_vm7, %v1649_v34, %v1636_v33  ;;  %v4635_v5 = vpack.c.bf16 %v1902_v4, %v1901_v3  ;;  %v4033_v3 = vld [vmem:[%s5710_s5 + $0x28] sm:$0xff]  ;;  %v4034_v4 = vld [vmem:[%s5710_s5 + $0x30] sm:$0xff] }
 0x734   :  { %v4659_v9 = vpack.c.bf16 %v4035_v7, %v4034_v4 }
 0x735   :  { %v1638_v35 = vpop.permute.xlu1 %1637 }
 0x736   :  { %v1644_v37 = vpop.permute.xlu0 %1643  ;;  %v1653_v40 = vsel %vm1651_vm7, %v1650_v39, %v1638_v35  ;;  %v4023_v39 = vld [vmem:[%s5714_s9] ss:$0 sm:$0xff] }
 0x737   :  { %v1655_v38 = vsel %vm1654_vm8, %v1652_v36, %v1644_v37  ;;  %v4022_v37 = vld [vmem:[%s5713_s8] ss:$0 sm:$0xff] }
 0x738   :  { %4375 = vmatprep.mubr.msk.f32.mxu0 %vm173_vm3, %v1655_v38 }
 0x739   :  { %v1646_v41 = vpop.permute.xlu1 %1645 }
 0x73a   :  { %v1656_v42 = vsel %vm1654_vm8, %v1653_v40, %v1646_v41 }
 0x73b   :  { %4376 = vmatmul.mubr.msk.f32.vlgmr.msra.gmra.mrb[16].mxu0 %vm173_vm3, %v1656_v42 }
 0x73c   :  { %4626 = vmatpush3.bf16.msra.mxu0 %v4623_v61 }
 0x73d   :  { %4628 = vmatprep.subr.bf16.mxu0 %v4627_v63 }
 0x740   :  { %4630 = vmatpush3.bf16.msra.mxu0 %v4627_v63 }
 0x741   :  { %4632 = vmatprep.subr.bf16.mxu0 %v4631_v2 }
 0x744   :  { %4634 = vmatpush3.bf16.msra.mxu0 %v4631_v2  ;;  %v4032_v2 = vld [vmem:[%s5710_s5 + $0x20] sm:$0xff] }
 0x745   :  { %4636 = vmatprep.subr.bf16.mxu0 %v4635_v5 }
 0x748   :  { %4638 = vmatpush3.bf16.msra.mxu0 %v4635_v5  ;;  %v4655_v5 = vpack.c.bf16 %v4033_v3, %v4032_v2 }
 0x749   :  { %4640 = vmatprep.subr.bf16.mxu0 %v4639_v10 }
 0x74a   :  { %4656 = vmatprep.subr.bf16.mxu1 %v4655_v5 }
 0x74c   :  { %4642 = vmatpush3.bf16.msra.mxu0 %v4639_v10 }
 0x74d   :  { %4644 = vmatprep.subr.bf16.mxu0 %v4643_v14 }
 0x750   :  { %4646 = vmatpush3.bf16.msra.mxu0 %v4643_v14 }
 0x751   :  { %4648 = vmatprep.subr.bf16.mxu0 %v4647_v19 }
 0x754   :  { %4650 = vmatpush3.bf16.msra.mxu0 %v4647_v19 }
 0x80e   :  { %v4377_v43 = vpop.f32.mrb[16].mxu0 }
 0x80f   :  { %v1743_v45 = vadd.f32 %v4377_v43, %v4992_v24  ;;  %v1733_v46 = vpop.f32.mrb[17].mxu0 }
 0x810   :  { %v1742_v47 = vadd.f32 %v1733_v46, %v4994_v26 }
 0x811   :  { %v5238_v6 = vadd.f32 %v4021_v44, %v1743_v45 }
 0x812   :  { %v5240_v8 = vadd.f32 %v4021_v44, %v1742_v47  ;;  %v1909_v47 = vld [vmem:[%s5717_s12 + $0x70] sm:$0xff] }
 0x813   :  { %v1758_v48 = vsel %vm173_vm3, %v5238_v6, 0.0  ;;  %v1764_v26 = vmul.f32 %v5238_v6, %v5238_v6 }
 0x814   :  { %1759 = vadd.xlane.f32.xlu1 %v1758_v48  ;;  %v1755_v49 = vsel %vm173_vm3, %v5240_v8, 0.0  ;;  %v1763_v50 = vmul.f32 %v5240_v8, %v5240_v8  ;;  %v1910_v48 = vld [vmem:[%s5717_s12 + $0x78] sm:$0xff] }
 0x815   :  { %1756 = vadd.xlane.f32.xlu0 %v1755_v49  ;;  %v1768_v51 = vsel %vm173_vm3, %v1764_v26, 0.0  ;;  %v4651_v49 = vpack.c.bf16 %v1910_v48, %v1909_v47 }
 0x816   :  { %v1765_v24 = vsel %vm173_vm3, %v1763_v50, 0.0  ;;  %v4024_v50 = vld [vmem:[%s5716_s11] ss:$0 sm:$0xff] }
 0x817   :  { %4652 = vmatprep.subr.bf16.mxu0 %v4651_v49 }
 0x818   :  { %4654 = vmatpush3.bf16.msra.mxu0 %v4651_v49 }
 0x819   :  { %1766 = vadd.xlane.f32.xlu0 %v1765_v24  ;;  %4465 = vmatprep.subr.mxu0 %v4843_v11 }
 0x81d   :  { %1769 = vadd.xlane.f32.xlu0 %v1768_v51 }
 0x8a1   :  { %v1760_v23 = vpop.xlane.xlu1 %1759 }
 0x8a2   :  { %v1757_v20 = vpop.xlane.xlu0 %1756  ;;  %v1762_v27 = vmul.f32 0.03125, %v1760_v23 }
 0x8a3   :  { %v1761_v21 = vmul.f32 0.03125, %v1757_v20 }
 0x8a4   :  { %v1774_v32 = vmul.f32 %v1762_v27, %v1762_v27  ;;  %v1778_v40 = vsub.f32 %v5238_v6, %v1762_v27 }
 0x8a5   :  { %v1773_v28 = vmul.f32 %v1761_v21, %v1761_v21  ;;  %v1777_v35 = vsub.f32 %v5240_v8, %v1761_v21 }
 0x8a6   :  { %v1767_v25 = vpop.xlane.xlu0 %1766 }
 0x8a7   :  { %v1771_v29 = vmul.f32 0.03125, %v1767_v25 }
 0x8a9   :  { %v1775_v30 = vsub.f32 %v1771_v29, %v1773_v28 }
 0x8aa   :  { %v1770_v31 = vpop.xlane.xlu0 %1769 }
 0x8ab   :  { %v1779_v16 = vadd.f32 1e-05, %v1775_v30  ;;  %v1772_v17 = vmul.f32 0.03125, %v1770_v31 }
 0x8ad   :  { %4770 = vrsqrt.f32 %v1779_v16  ;;  %v1776_v33 = vsub.f32 %v1772_v17, %v1774_v32  ;;  %v4030_v16 = vld [vmem:[%s5708_s3 + $0x1] ss:$0 sm:$0xff] }
 0x8af   :  { %v1780_v34 = vadd.f32 1e-05, %v1776_v33 }
 0x8b1   :  { %4772 = vrsqrt.f32 %v1780_v34 }
 0x8b7   :  { %v4771_v36 = vpop.eup %4770 }
 0x8b8   :  { %v1783_v38 = vmul.f32 %v4771_v36, %v1777_v35  ;;  %v4031_v35 = vld [vmem:[%s5709_s4 + $0x1] ss:$0 sm:$0xff] }
 0x8ba   :  { %v1791_v41 = vmul.f32 %v4022_v37, %v1783_v38 }
 0x8bb   :  { %v4773_v42 = vpop.eup %4772 }
 0x8bc   :  { %v1784_v43 = vmul.f32 %v4773_v42, %v1778_v40  ;;  %v1799_v44 = vadd.f32 %v4023_v39, %v1791_v41 }
 0x8be   :  { %v1792_v45 = vmul.f32 %v4022_v37, %v1784_v43  ;;  %4386 = vmatprep.mubr.msk.f32.mxu1 %vm173_vm3, %v1799_v44 }
 0x8c0   :  { %v1800_v46 = vadd.f32 %v4023_v39, %v1792_v45 }
 0x8c2   :  { %4387 = vmatmul.mubr.msk.f32.vlgmr.msra.gmra.mrb[20].mxu1 %vm173_vm3, %v1800_v46 }
 0x8c3   :  { %4658 = vmatpush3.bf16.msra.mxu1 %v4655_v5 }
 0x8c4   :  { %4660 = vmatprep.subr.bf16.mxu1 %v4659_v9 }
 0x8c7   :  { %4662 = vmatpush3.bf16.msra.mxu1 %v4659_v9 }
 0x8c8   :  { %4435 = vmatprep.subr.mxu1 %v4843_v11 }
 0x995   :  { %v4388_v24 = vpop.f32.mrb[20].mxu1 }
 0x996   :  { %v1890_v26 = vadd.f32 %v4388_v24, %v4024_v50  ;;  %v1884_v51 = vpop.f32.mrb[21].mxu1 }
 0x997   :  { %v1885_v52 = vadd.f32 %v4024_v50, %v1884_v51 }
 0x998   :  { %v1894_v54 = vmax.f32 %v1890_v26, 0.0 }
 0x999   :  { %v1893_v53 = vmax.f32 %v1885_v52, 0.0 }
 0x99b   :  { %4421 = vmatprep.mubr.f32.mxu0 %v1893_v53 }
 0x99c   :  { %4422 = vmatmul.mubr.f32.vlgmr.msra.gmra.mrb[18].mxu0 %v1894_v54 }
 0x99d   :  { %4467 = vmatprep.mubr.msk.f32.mxu0 %vm4847_vm4, %v4843_v11 }
 0xa6f   :  { %v4423_v55 = vpop.f32.mrb[18].mxu0 }
 0xa70   :  { %v1987_v57 = vadd.f32 %v4423_v55, %v5238_v6  ;;  %v1977_v58 = vpop.f32.mrb[19].mxu0 }
 0xa71   :  { %v1986_v59 = vadd.f32 %v1977_v58, %v5240_v8 }
 0xa72   :  { %v5333_v60 = vadd.f32 %v4027_v56, %v1987_v57 }
 0xa73   :  { %v5335_v61 = vadd.f32 %v4027_v56, %v1986_v59 }
 0xa74   :  { %v2004_v62 = vsel %vm173_vm3, %v5333_v60, 0.0  ;;  %v2010_v63 = vmul.f32 %v5333_v60, %v5333_v60 }
 0xa75   :  { %2005 = vadd.xlane.f32.xlu0 %v2004_v62  ;;  %v2001_v0 = vsel %vm173_vm3, %v5335_v61, 0.0  ;;  %v2009_v6 = vmul.f32 %v5335_v61, %v5335_v61 }
 0xa76   :  { %2002 = vadd.xlane.f32.xlu1 %v2001_v0  ;;  %v2014_v8 = vsel %vm173_vm3, %v2010_v63, 0.0 }
 0xa77   :  { %v2011_v1 = vsel %vm173_vm3, %v2009_v6, 0.0 }
 0xa79   :  { %2015 = vadd.xlane.f32.xlu0 %v2014_v8 }
 0xa7a   :  { %2012 = vadd.xlane.f32.xlu1 %v2011_v1 }
 0xb02   :  { %v2006_v10 = vpop.xlane.xlu0 %2005 }
 0xb03   :  { %v2008_v12 = vmul.f32 0.03125, %v2006_v10  ;;  %v2003_v13 = vpop.xlane.xlu1 %2002 }
 0xb04   :  { %v2007_v14 = vmul.f32 0.03125, %v2003_v13 }
 0xb05   :  { %v2020_v18 = vmul.f32 %v2008_v12, %v2008_v12  ;;  %v2024_v30 = vsub.f32 %v5333_v60, %v2008_v12 }
 0xb06   :  { %v2016_v15 = vpop.xlane.xlu0 %2015  ;;  %v2019_v21 = vmul.f32 %v2007_v14, %v2007_v14  ;;  %v2023_v32 = vsub.f32 %v5335_v61, %v2007_v14 }
 0xb07   :  { %v2018_v19 = vmul.f32 0.03125, %v2016_v15  ;;  %v2013_v20 = vpop.xlane.xlu1 %2012 }
 0xb08   :  { %v2017_v23 = vmul.f32 0.03125, %v2013_v20 }
 0xb09   :  { %v2022_v25 = vsub.f32 %v2018_v19, %v2020_v18 }
 0xb0a   :  { %v2021_v27 = vsub.f32 %v2017_v23, %v2019_v21 }
 0xb0b   :  { %v2026_v28 = vadd.f32 1e-05, %v2022_v25 }
 0xb0c   :  { %v2025_v29 = vadd.f32 1e-05, %v2021_v27 }
 0xb0d   :  { %4774 = vrsqrt.f32 %v2026_v28 }
 0xb0e   :  { %4776 = vrsqrt.f32 %v2025_v29 }
 0xb17   :  { %v4775_v31 = vpop.eup %4774 }
 0xb18   :  { %v4777_v17 = vpop.eup %4776  ;;  %v2030_v33 = vmul.f32 %v4775_v31, %v2024_v30 }
 0xb19   :  { %v2029_v34 = vmul.f32 %v4777_v17, %v2023_v32 }
 0xb1a   :  { %v2038_v36 = vmul.f32 %v4030_v16, %v2030_v33 }
 0xb1b   :  { %v2037_v37 = vmul.f32 %v4030_v16, %v2029_v34 }
 0xb1c   :  { %v2046_v39 = vadd.f32 %v4031_v35, %v2038_v36 }
 0xb1d   :  { %v2045_v38 = vadd.f32 %v4031_v35, %v2037_v37 }
 0xb1f   :  { %4432 = vmatprep.mubr.msk.f32.mxu1 %vm173_vm3, %v2045_v38 }
 0xb20   :  { %4433 = vmatmul.mubr.msk.f32.vlgmr.msra.gmra.mrb[22].mxu1 %vm173_vm3, %v2046_v39 }
 0xb21   :  { %4437 = vmatprep.mubr.msk.f32.mxu1 %vm4847_vm4, %v4843_v11 }
 0xbf3   :  { %v5372_v40 = vpop.f32.mrb[22].mxu1 }
 0xbf4   :  { %2137 = vrot.lane.b32.xlu0 %v5372_v40, %s4844_s19  ;;  %v5376_v41 = vpop.f32.mrb[23].mxu1 }
 0xbf5   :  { %2135 = vrot.lane.b32.xlu1 %v5376_v41, %s4844_s19 }
 0xbf8   :  { %2143 = vrot.lane.b32.xlu0 %v5376_v41, %s4845_s13 }
 0xbf9   :  { %2139 = vrot.lane.b32.xlu1 %v5376_v41, %s4846_s1 }
 0xbfc   :  { %2147 = vrot.lane.b32.xlu0 %v5376_v41, %s4848_s20 }
 0xbfd   :  { %2141 = vrot.lane.b32.xlu1 %v5372_v40, %s4846_s1 }
 0xc01   :  { %2145 = vrot.lane.b32.xlu1 %v5372_v40, %s4845_s13 }
 0xc05   :  { %2223 = vrot.lane.b32.xlu1 %v5372_v40, %s4848_s20 }
 0xc66   :  { %v5392_v42 = vpop.permute.xlu0 %2137 }
 0xc67   :  { %2375 = vrot.lane.b32.xlu1 %v5392_v42, %s4848_s20  ;;  %v5396_v43 = vpop.permute.xlu1 %2135 }
 0xc68   :  { %2299 = vrot.lane.b32.xlu0 %v5396_v43, %s4848_s20 }
 0xc6a   :  { %v5400_v44 = vpop.permute.xlu0 %2143 }
 0xc6b   :  { %v5402_v45 = vpop.permute.xlu1 %2139 }
 0xc6c   :  { %2451 = vrot.lane.b32.xlu0 %v5402_v45, %s4848_s20 }
 0xc6e   :  { %v2148_v46 = vpop.permute.xlu0 %2147 }
 0xc6f   :  { %4436 = vmatpush3.xpose.msk.msra.mxu1 %vm322_vm5, %v2148_v46  ;;  %v5407_v47 = vpop.permute.xlu1 %2141 }
 0xc70   :  { %2603 = vrot.lane.b32.xlu0 %v5400_v44, %s4848_s20  ;;  %2527 = vrot.lane.b32.xlu1 %v5407_v47, %s4848_s20 }
 0xc71   :  { %4440 = vmatprep.subr.mxu1 %v4843_v11 }
 0xc72   :  { %4438 = vmatmul.mubr.msk.f32.vlgmr.msra.gmra.mrb[24].mxu1 %vm322_vm5, %v5376_v41 }
 0xc73   :  { %v5416_v48 = vpop.permute.xlu1 %2145  ;;  %4442 = vmatprep.mubr.msk.f32.mxu1 %vm4847_vm4, %v4843_v11 }
 0xc74   :  { %2679 = vrot.lane.b32.xlu1 %v5416_v48, %s4848_s20 }
 0xc77   :  { %v2224_v49 = vpop.permute.xlu1 %2223 }
 0xc78   :  { %4441 = vmatpush3.xpose.msk.msra.mxu1 %vm322_vm5, %v2224_v49 }
 0xc79   :  { %4445 = vmatprep.subr.mxu1 %v4843_v11 }
 0xc7b   :  { %4443 = vmatmul.mubr.msk.f32.vlgmr.msra.gmra.mrb[26].mxu1 %vm322_vm5, %v5372_v40 }
 0xc7c   :  { %4447 = vmatprep.mubr.msk.f32.mxu1 %vm4847_vm4, %v4843_v11 }
 0xcd9   :  { %v2376_v24 = vpop.permute.xlu1 %2375 }
 0xcda   :  { %v2300_v50 = vpop.permute.xlu0 %2299 }
 0xcdb   :  { %4446 = vmatpush3.xpose.msk.msra.mxu1 %vm322_vm5, %v2300_v50 }
 0xcdc   :  { %4450 = vmatprep.subr.mxu1 %v4843_v11 }
 0xcde   :  { %v2452_v26 = vpop.permute.xlu0 %2451  ;;  %4448 = vmatmul.mubr.msk.f32.vlgmr.msra.gmra.mrb[28].mxu1 %vm322_vm5, %v5396_v43 }
 0xcdf   :  { %4451 = vmatpush3.xpose.msk.msra.mxu1 %vm322_vm5, %v2376_v24  ;;  %4452 = vmatprep.mubr.msk.f32.mxu1 %vm4847_vm4, %v4843_v11 }
 0xce0   :  { %4455 = vmatprep.subr.mxu1 %v4843_v11 }
 0xce2   :  { %v2604_v51 = vpop.permute.xlu0 %2603  ;;  %4453 = vmatmul.mubr.msk.f32.vlgmr.msra.gmra.mrb[30].mxu1 %vm322_vm5, %v5392_v42  ;;  %v2528_v52 = vpop.permute.xlu1 %2527 }
 0xce3   :  { %4456 = vmatpush3.xpose.msk.msra.mxu1 %vm322_vm5, %v2452_v26  ;;  %4466 = vmatpush3.xpose.msk.msra.mxu0 %vm322_vm5, %v2604_v51 }
 0xce4   :  { %4457 = vmatprep.mubr.msk.f32.mxu1 %vm4847_vm4, %v4843_v11  ;;  %4460 = vmatprep.subr.mxu1 %v4843_v11 }
 0xce5   :  { %4475 = vmatprep.subr.mxu0 %v4843_v11 }
 0xce6   :  { %4458 = vmatmul.mubr.msk.f32.vlgmr.msra.gmra.mrb[32].mxu1 %vm322_vm5, %v5402_v45  ;;  %4468 = vmatmul.mubr.msk.f32.vlgmr.msra.gmra.mrb[20].mxu0 %vm322_vm5, %v5400_v44  ;;  %v2680_v53 = vpop.permute.xlu1 %2679 }
 0xce7   :  { %4461 = vmatpush3.xpose.msk.msra.mxu1 %vm322_vm5, %v2528_v52  ;;  %4462 = vmatprep.mubr.msk.f32.mxu1 %vm4847_vm4, %v4843_v11 }
 0xce8   :  { %4470 = vmatprep.subr.mxu1 %v4843_v11  ;;  %4477 = vmatprep.mubr.msk.f32.mxu0 %vm4847_vm4, %v4843_v11 }
 0xcea   :  { %4463 = vmatmul.mubr.msk.f32.vlgmr.msra.gmra.mrb[34].mxu1 %vm322_vm5, %v5407_v47 }
 0xceb   :  { %4471 = vmatpush3.xpose.msk.msra.mxu1 %vm322_vm5, %v2680_v53  ;;  %4472 = vmatprep.mubr.msk.f32.mxu1 %vm4847_vm4, %v4843_v11 }
 0xcec   :  { %4480 = vmatprep.subr.mxu1 %v4843_v11 }
 0xcee   :  { %4473 = vmatmul.mubr.msk.f32.vlgmr.msra.gmra.mrb[36].mxu1 %vm322_vm5, %v5416_v48 }
 0xcef   :  { %4482 = vmatprep.mubr.msk.f32.mxu1 %vm4847_vm4, %v4843_v11 }
 0xd45   :  { %v2219_v54 = vpop.f32.mrb[24].mxu1 }
 0xd46   :  { %v2220_v55 = vadd.f32 %v2219_v54, %v5127_v22  ;;  %v4439_v56 = vpop.f32.mrb[25].mxu1 }
 0xd48   :  { %v2755_v57 = vsel %vm322_vm5, %v2220_v55, -inf }
 0xd49   :  { %2756 = vmax.xlane.f32.xlu0 %v2755_v57 }
 0xd4e   :  { %v2295_v58 = vpop.f32.mrb[26].mxu1 }
 0xd4f   :  { %v2296_v59 = vadd.f32 %v2295_v58, %v5127_v22  ;;  %v4444_v62 = vpop.f32.mrb[27].mxu1 }
 0xd51   :  { %v2758_v63 = vsel %vm322_vm5, %v2296_v59, -inf }
 0xd52   :  { %2759 = vmax.xlane.f32.xlu1 %v2758_v63 }
 0xdb1   :  { %v2371_v0 = vpop.f32.mrb[28].mxu1 }
 0xdb2   :  { %v2372_v6 = vadd.f32 %v2371_v0, %v5127_v22  ;;  %v4449_v8 = vpop.f32.mrb[29].mxu1 }
 0xdb4   :  { %v2761_v1 = vsel %vm322_vm5, %v2372_v6, -inf }
 0xdb5   :  { %2762 = vmax.xlane.f32.xlu0 %v2761_v1  ;;  %v2447_v2 = vpop.f32.mrb[30].mxu1 }
 0xdb6   :  { %v2448_v3 = vadd.f32 %v2447_v2, %v5127_v22  ;;  %v4454_v4 = vpop.f32.mrb[31].mxu1 }
 0xdb8   :  { %v2764_v5 = vsel %vm322_vm5, %v2448_v3, -inf }
 0xdb9   :  { %v2675_v7 = vpop.f32.mrb[20].mxu0  ;;  %2765 = vmax.xlane.f32.xlu0 %v2764_v5  ;;  %v2523_v9 = vpop.f32.mrb[32].mxu1 }
 0xdba   :  { %v2524_v10 = vadd.f32 %v2523_v9, %v5127_v22  ;;  %v4459_v12 = vpop.f32.mrb[33].mxu1  ;;  %v4469_v13 = vpop.f32.mrb[21].mxu0  ;;  %v2676_v14 = vadd.f32 %v2675_v7, %v5127_v22 }
 0xdbc   :  { %v2767_v15 = vsel %vm322_vm5, %v2524_v10, -inf  ;;  %v2773_v21 = vsel %vm322_vm5, %v2676_v14, -inf }
 0xdbd   :  { %2768 = vmax.xlane.f32.xlu1 %v2767_v15  ;;  %v2599_v18 = vpop.f32.mrb[34].mxu1 }
 0xdbe   :  { %v2600_v19 = vadd.f32 %v2599_v18, %v5127_v22  ;;  %v4464_v20 = vpop.f32.mrb[35].mxu1 }
 0xdc0   :  { %v2770_v23 = vsel %vm322_vm5, %v2600_v19, -inf }
 0xdc1   :  { %2774 = vmax.xlane.f32.xlu1 %v2773_v21  ;;  %2771 = vmax.xlane.f32.xlu0 %v2770_v23  ;;  %v2751_v25 = vpop.f32.mrb[36].mxu1 }
 0xdc2   :  { %v2752_v27 = vadd.f32 %v2751_v25, %v5127_v22  ;;  %v4474_v28 = vpop.f32.mrb[37].mxu1 }
 0xdc4   :  { %v2776_v29 = vsel %vm322_vm5, %v2752_v27, -inf }
 0xdc5   :  { %2777 = vmax.xlane.f32.xlu0 %v2776_v29 }
 0xdd2   :  { %2843 = vrot.lane.b32.xlu1 %v5376_v41, %s4850_s21 }
 0xdd6   :  { %2995 = vrot.lane.b32.xlu1 %v5396_v43, %s4850_s21  ;;  %v2757_v31 = vpop.xlane.xlu0 %2756 }
 0xdd7   :  { %v2779_v32 = vsub.f32 %v2220_v55, %v2757_v31 }
 0xdd9   :  { %v2787_v17 = vmul.f32 1.442695, %v2779_v32 }
 0xdda   :  { %3071 = vrot.lane.b32.xlu1 %v5392_v42, %s4850_s21 }
 0xddb   :  { %2919 = vrot.lane.b32.xlu0 %v5372_v40, %s4850_s21 }
 0xdde   :  { %3223 = vrot.lane.b32.xlu1 %v5407_v47, %s4850_s21 }
 0xddf   :  { %3147 = vrot.lane.b32.xlu0 %v5402_v45, %s4850_s21  ;;  %v2760_v22 = vpop.xlane.xlu1 %2759 }
 0xde0   :  { %v2780_v30 = vsub.f32 %v2296_v59, %v2760_v22 }
 0xde2   :  { %v2789_v16 = vmul.f32 1.442695, %v2780_v30 }
 0xde4   :  { %4778 = vpow2.f32 %v2789_v16 }
 0xde5   :  { %4780 = vpow2.f32 %v2787_v17 }
 0xdee   :  { %v5492_v33 = vpop.eup %4778 }
 0xdef   :  { %v2806_v34 = vsel %vm322_vm5, %v5492_v33, 0.0  ;;  %v5496_v35 = vpop.eup %4780 }
 0xdf0   :  { %v2803_v36 = vsel %vm322_vm5, %v5496_v35, 0.0 }
 0xdfe   :  { %2807 = vadd.xlane.f32.xlu0 %v2806_v34 }
 0xe02   :  { %2804 = vadd.xlane.f32.xlu1 %v2803_v36 }
 0xe42   :  { %v2763_v37 = vpop.xlane.xlu0 %2762 }
 0xe43   :  { %v2781_v38 = vsub.f32 %v2372_v6, %v2763_v37 }
 0xe45   :  { %v2791_v39 = vmul.f32 1.442695, %v2781_v38 }
 0xe46   :  { %v2766_v40 = vpop.xlane.xlu0 %2765 }
 0xe47   :  { %4782 = vpow2.f32 %v2791_v39  ;;  %v2782_v41 = vsub.f32 %v2448_v3, %v2766_v40 }
 0xe49   :  { %v2793_v42 = vmul.f32 1.442695, %v2782_v41 }
 0xe4a   :  { %v2769_v43 = vpop.xlane.xlu1 %2768 }
 0xe4b   :  { %4784 = vpow2.f32 %v2793_v42  ;;  %v2783_v45 = vsub.f32 %v2524_v10, %v2769_v43  ;;  %v4062_v43 = vld [vmem:[%s5711_s6 + $0x20] sm:$0xff] }
 0xe4d   :  { %v2795_v52 = vmul.f32 1.442695, %v2783_v45  ;;  %v4063_v45 = vld [vmem:[%s5711_s6 + $0x28] sm:$0xff] }
 0xe4e   :  { %v2772_v46 = vpop.xlane.xlu0 %2771  ;;  %v2775_v47 = vpop.xlane.xlu1 %2774 }
 0xe4f   :  { %v2784_v49 = vsub.f32 %v2600_v19, %v2772_v46  ;;  %v2785_v50 = vsub.f32 %v2676_v14, %v2775_v47  ;;  %v4663_v46 = vpack.c.bf16 %v4063_v45, %v4062_v43  ;;  %v4093_v43 = vld [vmem:[%s5717_s12 + $0xd8] sm:$0xff] }
 0xe51   :  { %v4783_v24 = vpop.eup %4782  ;;  %v2797_v26 = vmul.f32 1.442695, %v2784_v49  ;;  %v2799_v51 = vmul.f32 1.442695, %v2785_v50  ;;  %v4064_v50 = vld [vmem:[%s5711_s6 + $0x30] sm:$0xff] }
 0xe52   :  { %v2778_v53 = vpop.xlane.xlu0 %2777  ;;  %v2844_v54 = vpop.permute.xlu1 %2843  ;;  %v2809_v55 = vsel %vm322_vm5, %v4783_v24, 0.0 }
 0xe53   :  { %4786 = vpow2.f32 %v2797_v26  ;;  %v2786_v56 = vsub.f32 %v2752_v27, %v2778_v53  ;;  %2810 = vadd.xlane.f32.xlu1 %v2809_v55  ;;  %4476 = vmatpush3.msra.mxu0 %v2844_v54 }
 0xe54   :  { %4788 = vpow2.f32 %v2799_v51  ;;  %4485 = vmatprep.subr.mxu0 %v4843_v11 }
 0xe55   :  { %v4785_v57 = vpop.eup %4784  ;;  %v2801_v58 = vmul.f32 1.442695, %v2786_v56  ;;  %4790 = vpow2.f32 %v2795_v52 }
 0xe56   :  { %v2920_v59 = vpop.permute.xlu0 %2919  ;;  %v2812_v62 = vsel %vm322_vm5, %v4785_v57, 0.0  ;;  %v2996_v5 = vpop.permute.xlu1 %2995 }
 0xe57   :  { %4792 = vpow2.f32 %v2801_v58  ;;  %4481 = vmatpush3.msra.mxu1 %v2920_v59  ;;  %2813 = vadd.xlane.f32.xlu0 %v2812_v62 }
 0xe58   :  { %4490 = vmatprep.subr.mxu1 %v4843_v11 }
 0xe5a   :  { %v3072_v7 = vpop.permute.xlu1 %3071  ;;  %v3148_v9 = vpop.permute.xlu0 %3147 }
 0xe5d   :  { %v4787_v63 = vpop.eup %4786 }
 0xe5e   :  { %v5504_v0 = vpop.eup %4788  ;;  %v2818_v6 = vsel %vm322_vm5, %v4787_v63, 0.0  ;;  %v3224_v10 = vpop.permute.xlu1 %3223 }
 0xe5f   :  { %2819 = vadd.xlane.f32.xlu0 %v2818_v6  ;;  %v2821_v8 = vsel %vm322_vm5, %v5504_v0, 0.0  ;;  %v4791_v1 = vpop.eup %4790 }
 0xe60   :  { %2822 = vadd.xlane.f32.xlu1 %v2821_v8  ;;  %v2815_v4 = vsel %vm322_vm5, %v4791_v1, 0.0 }
 0xe61   :  { %v4793_v2 = vpop.eup %4792 }
 0xe62   :  { %v2824_v3 = vsel %vm322_vm5, %v4793_v2, 0.0 }
 0xe63   :  { %2825 = vadd.xlane.f32.xlu0 %v2824_v3 }
 0xe64   :  { %2816 = vadd.xlane.f32.xlu1 %v2815_v4 }
 0xe75   :  { %3375 = vrot.lane.b32.xlu1 %v5416_v48, %s4850_s21 }
 0xe79   :  { %3299 = vrot.lane.b32.xlu0 %v5400_v44, %s4850_s21 }
 0xe8b   :  { %v2808_v12 = vpop.xlane.xlu0 %2807 }
 0xe8c   :  { %4794 = vrcp.f32 %v2808_v12 }
 0xe8f   :  { %v2805_v13 = vpop.xlane.xlu1 %2804 }
 0xe90   :  { %4796 = vrcp.f32 %v2805_v13 }
 0xe96   :  { %v4795_v14 = vpop.eup %4794 }
 0xe97   :  { %v2836_v15 = vmul.f32 %v4795_v14, %v5492_v33 }
 0xe99   :  { %4483 = vmatmul.mubr.msk.f32.vlgmr.msra.gmra.mrb[38].mxu1 %vm322_vm5, %v2836_v15 }
 0xe9a   :  { %v4797_v18 = vpop.eup %4796  ;;  %4491 = vmatpush3.msra.mxu1 %v3072_v7  ;;  %4492 = vmatprep.mubr.msk.f32.mxu1 %vm4847_vm4, %v4843_v11 }
 0xe9b   :  { %v2835_v44 = vmul.f32 %v4797_v18, %v5496_v35  ;;  %4500 = vmatprep.subr.mxu1 %v4843_v11 }
 0xe9d   :  { %4478 = vmatmul.mubr.msk.f32.vlgmr.msra.gmra.mrb[22].mxu0 %vm322_vm5, %v2835_v44 }
 0xe9e   :  { %4486 = vmatpush3.msra.mxu0 %v2996_v5  ;;  %4487 = vmatprep.mubr.msk.f32.mxu0 %vm4847_vm4, %v4843_v11 }
 0xe9f   :  { %4495 = vmatprep.subr.mxu0 %v4843_v11 }
 0xee0   :  { %v2811_v48 = vpop.xlane.xlu1 %2810 }
 0xee1   :  { %4798 = vrcp.f32 %v2811_v48 }
 0xee4   :  { %v2814_v19 = vpop.xlane.xlu0 %2813 }
 0xee5   :  { %4800 = vrcp.f32 %v2814_v19 }
 0xeeb   :  { %v4799_v20 = vpop.eup %4798 }
 0xeec   :  { %v2837_v21 = vmul.f32 %v4799_v20, %v4783_v24  ;;  %v2820_v23 = vpop.xlane.xlu0 %2819  ;;  %v4065_v24 = vld [vmem:[%s5711_s6 + $0x38] sm:$0xff] }
 0xeed   :  { %4802 = vrcp.f32 %v2820_v23  ;;  %v2823_v25 = vpop.xlane.xlu1 %2822  ;;  %v4667_v26 = vpack.c.bf16 %v4065_v24, %v4064_v50  ;;  %v4075_v23 = vld [vmem:[%s5715_s10 + $0x28] sm:$0xff] }
 0xeee   :  { %4488 = vmatmul.mubr.msk.f32.vlgmr.msra.gmra.mrb[24].mxu0 %vm322_vm5, %v2837_v21  ;;  %v4074_v21 = vld [vmem:[%s5715_s10 + $0x20] sm:$0xff] }
 0xeef   :  { %v4801_v27 = vpop.eup %4800  ;;  %4496 = vmatpush3.msra.mxu0 %v3148_v9  ;;  %4497 = vmatprep.mubr.msk.f32.mxu0 %vm4847_vm4, %v4843_v11 }
 0xef0   :  { %v2838_v28 = vmul.f32 %v4801_v27, %v4785_v57  ;;  %v2826_v29 = vpop.xlane.xlu0 %2825  ;;  %4505 = vmatprep.subr.mxu0 %v4843_v11  ;;  %v4671_v27 = vpack.c.bf16 %v4075_v23, %v4074_v21 }
 0xef1   :  { %4804 = vrcp.f32 %v2826_v29  ;;  %v2817_v22 = vpop.xlane.xlu1 %2816 }
 0xef2   :  { %4806 = vrcp.f32 %v2817_v22  ;;  %4493 = vmatmul.mubr.msk.f32.vlgmr.msra.gmra.mrb[40].mxu1 %vm322_vm5, %v2838_v28  ;;  %v4077_v28 = vld [vmem:[%s5715_s10 + $0x38] sm:$0xff]  ;;  %v4082_v22 = vld [vmem:[%s5717_s12 + $0x80] sm:$0xff] }
 0xef3   :  { %4501 = vmatpush3.msra.mxu1 %v3224_v10  ;;  %4502 = vmatprep.mubr.msk.f32.mxu1 %vm4847_vm4, %v4843_v11  ;;  %4808 = vrcp.f32 %v2823_v25  ;;  %v4069_v10 = vld [vmem:[%s5712_s7 + $0x1] ss:$0 sm:$0xff]  ;;  %v4076_v25 = vld [vmem:[%s5715_s10 + $0x30] sm:$0xff] }
 0xef4   :  { %4510 = vmatprep.subr.mxu1 %v4843_v11  ;;  %v3300_v36 = vpop.permute.xlu0 %3299  ;;  %v4675_v29 = vpack.c.bf16 %v4077_v28, %v4076_v25  ;;  %v4099_v25 = vld [vmem:[%s5738_s23 + $0x1] ss:$0 sm:$0xff] }
 0xef5   :  { %v3376_v32 = vpop.permute.xlu1 %3375 }
 0xef7   :  { %v4803_v30 = vpop.eup %4802 }
 0xef8   :  { %v2840_v31 = vmul.f32 %v4803_v30, %v4787_v63  ;;  %v4083_v30 = vld [vmem:[%s5717_s12 + $0x88] sm:$0xff] }
 0xefa   :  { %4503 = vmatmul.mubr.msk.f32.vlgmr.msra.gmra.mrb[42].mxu1 %vm322_vm5, %v2840_v31  ;;  %v4084_v31 = vld [vmem:[%s5717_s12 + $0x90] sm:$0xff] }
 0xefb   :  { %v4805_v16 = vpop.eup %4804  ;;  %4511 = vmatpush3.msra.mxu1 %v3376_v32  ;;  %4512 = vmatprep.mubr.msk.f32.mxu1 %vm4847_vm4, %v4843_v11  ;;  %v4679_v32 = vpack.c.bf16 %v4083_v30, %v4082_v22 }
 0xefc   :  { %v4807_v17 = vpop.eup %4806  ;;  %v2842_v33 = vmul.f32 %v4805_v16, %v4793_v2  ;;  %4672 = vmatprep.subr.bf16.mxu1 %v4671_v27  ;;  %v4085_v16 = vld [vmem:[%s5717_s12 + $0x98] sm:$0xff] }
 0xefd   :  { %v2839_v34 = vmul.f32 %v4807_v17, %v4791_v1  ;;  %v4809_v35 = vpop.eup %4808  ;;  %v4683_v17 = vpack.c.bf16 %v4085_v16, %v4084_v31 }
 0xefe   :  { %4513 = vmatmul.mubr.msk.f32.vlgmr.msra.gmra.mrb[44].mxu1 %vm322_vm5, %v2842_v33  ;;  %v2841_v37 = vmul.f32 %v4809_v35, %v5504_v0  ;;  %v4086_v33 = vld [vmem:[%s5717_s12 + $0xa0] sm:$0xff] }
 0xeff   :  { %4498 = vmatmul.mubr.msk.f32.vlgmr.msra.gmra.mrb[26].mxu0 %vm322_vm5, %v2839_v34  ;;  %4674 = vmatpush3.bf16.msra.mxu1 %v4671_v27  ;;  %v4087_v34 = vld [vmem:[%s5717_s12 + $0xa8] sm:$0xff] }
 0xf00   :  { %4506 = vmatpush3.msra.mxu0 %v3300_v36  ;;  %4507 = vmatprep.mubr.msk.f32.mxu0 %vm4847_vm4, %v4843_v11  ;;  %v4687_v35 = vpack.c.bf16 %v4087_v34, %v4086_v33  ;;  %v4088_v36 = vld [vmem:[%s5717_s12 + $0xb0] sm:$0xff] }
 0xf01   :  { %4664 = vmatprep.subr.bf16.mxu0 %v4663_v46  ;;  %4676 = vmatprep.subr.bf16.mxu1 %v4675_v29 }
 0xf03   :  { %4508 = vmatmul.mubr.msk.f32.vlgmr.msra.gmra.mrb[28].mxu0 %vm322_vm5, %v2841_v37  ;;  %4678 = vmatpush3.bf16.msra.mxu1 %v4675_v29  ;;  %v4089_v37 = vld [vmem:[%s5717_s12 + $0xb8] sm:$0xff] }
 0xf04   :  { %4666 = vmatpush3.bf16.msra.mxu0 %v4663_v46  ;;  %v4095_v46 = vld [vmem:[%s5717_s12 + $0xe8] sm:$0xff] }
 0xf05   :  { %4668 = vmatprep.subr.bf16.mxu0 %v4667_v26 }
 0xf08   :  { %4670 = vmatpush3.bf16.msra.mxu0 %v4667_v26 }
 0xf09   :  { %4680 = vmatprep.subr.bf16.mxu0 %v4679_v32 }
 0xf6c   :  { %v2991_v38 = vpop.f32.mrb[38].mxu1 }
 0xf6d   :  { %v4484_v39 = vpop.f32.mrb[39].mxu1 }
 0xf6e   :  { %v4090_v39 = vld [vmem:[%s5717_s12 + $0xc0] sm:$0xff] }
 0xf70   :  { %v2915_v40 = vpop.f32.mrb[22].mxu0 }
 0xf71   :  { %v4479_v41 = vpop.f32.mrb[23].mxu0 }
 0xfc1   :  { %v3067_v42 = vpop.f32.mrb[24].mxu0 }
 0xfc2   :  { %3453 = vrot.lane.b32.xlu0 %v3067_v42, %s4851_s29  ;;  %v4489_v11 = vpop.f32.mrb[25].mxu0  ;;  %v4092_v42 = vld [vmem:[%s5717_s12 + $0xd0] sm:$0xff] }
 0xfc3   :  { %v4699_v45 = vpack.c.bf16 %v4093_v43, %v4092_v42  ;;  %v4094_v11 = vld [vmem:[%s5717_s12 + $0xe0] sm:$0xff] }
 0xfc5   :  { %v3143_v47 = vpop.f32.mrb[40].mxu1 }
 0xfc6   :  { %3455 = vrot.lane.b32.xlu1 %v3143_v47, %s4851_s29  ;;  %v4494_v49 = vpop.f32.mrb[41].mxu1  ;;  %v4703_v47 = vpack.c.bf16 %v4095_v46, %v4094_v11 }
 0xfcd   :  { %v3295_v51 = vpop.f32.mrb[42].mxu1 }
 0xfce   :  { %3463 = vrot.lane.b32.xlu1 %v3295_v51, %s5739_s27  ;;  %v4504_v52 = vpop.f32.mrb[43].mxu1 }
 0xfd1   :  { %v3447_v53 = vpop.f32.mrb[44].mxu1 }
 0xfd2   :  { %v3219_v54 = vpop.f32.mrb[26].mxu0  ;;  %3471 = vrot.lane.b32.xlu1 %v3447_v53, %s5740_s28  ;;  %v4514_v55 = vpop.f32.mrb[45].mxu1 }
 0xfd3   :  { %3461 = vrot.lane.b32.xlu0 %v3219_v54, %s5739_s27  ;;  %v4499_v56 = vpop.f32.mrb[27].mxu0 }
 0xfd6   :  { %v3371_v57 = vpop.f32.mrb[28].mxu0 }
 0xfd7   :  { %3469 = vrot.lane.b32.xlu0 %v3371_v57, %s5740_s28  ;;  %v4509_v58 = vpop.f32.mrb[29].mxu0 }
0x1034   :  { %v3454_v62 = vpop.permute.xlu0 %3453 }
0x1035   :  { %v3475_v6 = vsel %vm322_vm5, %v2915_v40, %v3454_v62  ;;  %v4091_v40 = vld [vmem:[%s5717_s12 + $0xc8] sm:$0xff] }
0x1036   :  { %v4695_v41 = vpack.c.bf16 %v4091_v40, %v4090_v39 }
0x1038   :  { %v3456_v59 = vpop.permute.xlu1 %3455 }
0x1039   :  { %v3476_v1 = vsel %vm322_vm5, %v2991_v38, %v3456_v59  ;;  %v4691_v38 = vpack.c.bf16 %v4089_v37, %v4088_v36  ;;  %v3880_v37 = vld [vmem:[%s5721_s16 + $0x18] sm:$0xff] }
0x1040   :  { %v3464_v63 = vpop.permute.xlu1 %3463 }
0x1041   :  { %v3478_v4 = vsel %vm1651_vm7, %v3476_v1, %v3464_v63  ;;  %v4073_v1 = vld [vmem:[%s5714_s9 + $0x1] ss:$0 sm:$0xff] }
0x1044   :  { %v3472_v8 = vpop.permute.xlu1 %3471 }
0x1045   :  { %v3462_v0 = vpop.permute.xlu0 %3461  ;;  %v3480_v7 = vsel %vm1654_vm8, %v3478_v4, %v3472_v8 }
0x1046   :  { %v3477_v2 = vsel %vm1651_vm7, %v3475_v6, %v3462_v0  ;;  %v4072_v6 = vld [vmem:[%s5713_s8 + $0x1] ss:$0 sm:$0xff] }
0x1049   :  { %v3470_v3 = vpop.permute.xlu0 %3469 }
0x104a   :  { %v3479_v5 = vsel %vm1654_vm8, %v3477_v2, %v3470_v3 }
0x104b   :  { %4523 = vmatprep.mubr.msk.f32.mxu0 %vm173_vm3, %v3479_v5 }
0x104c   :  { %4524 = vmatmul.mubr.msk.f32.vlgmr.msra.gmra.mrb[30].mxu0 %vm173_vm3, %v3480_v7 }
0x104d   :  { %4682 = vmatpush3.bf16.msra.mxu0 %v4679_v32 }
0x104e   :  { %4684 = vmatprep.subr.bf16.mxu0 %v4683_v17 }
0x1051   :  { %4686 = vmatpush3.bf16.msra.mxu0 %v4683_v17 }
0x1052   :  { %4688 = vmatprep.subr.bf16.mxu0 %v4687_v35 }
0x1055   :  { %4690 = vmatpush3.bf16.msra.mxu0 %v4687_v35  ;;  %v3879_v35 = vld [vmem:[%s5721_s16 + $0x10] sm:$0xff] }
0x1056   :  { %4692 = vmatprep.subr.bf16.mxu0 %v4691_v38 }
0x1059   :  { %4694 = vmatpush3.bf16.msra.mxu0 %v4691_v38  ;;  %v4715_v38 = vpack.c.bf16 %v3880_v37, %v3879_v35 }
0x105a   :  { %4696 = vmatprep.subr.bf16.mxu0 %v4695_v41 }
0x105d   :  { %4698 = vmatpush3.bf16.msra.mxu0 %v4695_v41 }
0x105e   :  { %4700 = vmatprep.subr.bf16.mxu0 %v4699_v45 }
0x1061   :  { %4702 = vmatpush3.bf16.msra.mxu0 %v4699_v45 }
0x1062   :  { %4704 = vmatprep.subr.bf16.mxu0 %v4703_v47 }
0x1065   :  { %4706 = vmatpush3.bf16.msra.mxu0 %v4703_v47 }
0x111f   :  { %v4525_v9 = vpop.f32.mrb[30].mxu0 }
0x1120   :  { %v3568_v12 = vadd.f32 %v4525_v9, %v5333_v60  ;;  %v3558_v13 = vpop.f32.mrb[31].mxu0 }
0x1121   :  { %v3567_v14 = vadd.f32 %v3558_v13, %v5335_v61  ;;  %v4097_v13 = vld [vmem:[%s5717_s12 + $0xf8] sm:$0xff] }
0x1122   :  { %v5573_v15 = vadd.f32 %v4069_v10, %v3568_v12  ;;  %v4096_v12 = vld [vmem:[%s5717_s12 + $0xf0] sm:$0xff] }
0x1123   :  { %v5575_v18 = vadd.f32 %v4069_v10, %v3567_v14  ;;  %v4707_v14 = vpack.c.bf16 %v4097_v13, %v4096_v12 }
0x1124   :  { %v3586_v44 = vsel %vm173_vm3, %v5573_v15, 0.0  ;;  %v3592_v61 = vmul.f32 %v5573_v15, %v5573_v15 }
0x1125   :  { %3587 = vadd.xlane.f32.xlu1 %v3586_v44  ;;  %v3583_v48 = vsel %vm173_vm3, %v5575_v18, 0.0  ;;  %v3591_v19 = vmul.f32 %v5575_v18, %v5575_v18  ;;  %4708 = vmatprep.subr.bf16.mxu0 %v4707_v14  ;;  %v4079_v44 = vld [vmem:[%s5716_s11 + $0x1] ss:$0 sm:$0xff] }
0x1126   :  { %3584 = vadd.xlane.f32.xlu0 %v3583_v48  ;;  %v3596_v20 = vsel %vm173_vm3, %v3592_v61, 0.0  ;;  %4710 = vmatpush3.bf16.msra.mxu0 %v4707_v14 }
0x1127   :  { %v3593_v60 = vsel %vm173_vm3, %v3591_v19, 0.0 }
0x112a   :  { %3594 = vadd.xlane.f32.xlu0 %v3593_v60 }
0x112e   :  { %3597 = vadd.xlane.f32.xlu0 %v3596_v20 }
0x11b2   :  { %v3588_v24 = vpop.xlane.xlu1 %3587 }
0x11b3   :  { %v3585_v49 = vpop.xlane.xlu0 %3584  ;;  %v3590_v51 = vmul.f32 0.03125, %v3588_v24 }
0x11b4   :  { %v3589_v50 = vmul.f32 0.03125, %v3585_v49 }
0x11b5   :  { %v3602_v56 = vmul.f32 %v3590_v51, %v3590_v51  ;;  %v3606_v2 = vsub.f32 %v5573_v15, %v3590_v51 }
0x11b6   :  { %v3601_v52 = vmul.f32 %v3589_v50, %v3589_v50  ;;  %v3605_v63 = vsub.f32 %v5575_v18, %v3589_v50 }
0x11b7   :  { %v3595_v26 = vpop.xlane.xlu0 %3594 }
0x11b8   :  { %v3599_v53 = vmul.f32 0.03125, %v3595_v26 }
0x11ba   :  { %v3603_v54 = vsub.f32 %v3599_v53, %v3601_v52 }
0x11bb   :  { %v3598_v55 = vpop.xlane.xlu0 %3597 }
0x11bc   :  { %v3607_v57 = vadd.f32 1e-05, %v3603_v54  ;;  %v3600_v58 = vmul.f32 0.03125, %v3598_v55  ;;  %v4100_v55 = vld [vmem:[%s5719_s14] ss:$0 sm:$0xff]  ;;  %s4854_s14 = smov [#allocation2]  }
0x11bd   :  { %s3976_s27 = sshll.u32 %s4854_s14, 4  ;;  %s3977_s27 = int_to_ptr.vmem [resolvable:$true] %s3976_s27 }
0x11be   :  { %4810 = vrsqrt.f32 %v3607_v57  ;;  %v3604_v59 = vsub.f32 %v3600_v58, %v3602_v56  ;;  %p4823_p1 = scmp.lt.s32.totalorder %s3977_s27, %s3977_s27 }
0x11c0   :  { %v3608_v62 = vadd.f32 1e-05, %v3604_v59  ;;  %v4101_v59 = vld [vmem:[%s5720_s15] ss:$0 sm:$0xff]  ;;  %s4818_s15 = scalar_lea.vmem %s3977_s27, 256 }
0x11c1   :  { %p4819_p0 = scmp.ne.s32.totalorder %s3977_s27, %s4818_s15  ;;  %p4824_p2 = scmp.lt.s32.totalorder %s4818_s15, %s4818_s15 }
0x11c2   :  { %4812 = vrsqrt.f32 %v3608_v62 }
0x11c3   :  { %p4825_p3 = por %p4824_p2, %p4823_p1 }
0x11c5   :  { %p4826_p4 = pnand %p4825_p3, %p4819_p0 }
0x11c8   :  { %v4811_v0 = vpop.eup %4810 }
0x11c9   :  { %v3611_v8 = vmul.f32 %v4811_v0, %v3605_v63 }
0x11cb   :  { %v3619_v3 = vmul.f32 %v4072_v6, %v3611_v8  ;;  %v4102_v8 = vld [vmem:[%s5722_s17] ss:$0 sm:$0xff] }
0x11cc   :  { %v4813_v4 = vpop.eup %4812 }
0x11cd   :  { %v3612_v5 = vmul.f32 %v4813_v4, %v3606_v2  ;;  %v3627_v7 = vadd.f32 %v4073_v1, %v3619_v3 }
0x11cf   :  { %v3620_v9 = vmul.f32 %v4072_v6, %v3612_v5  ;;  %4534 = vmatprep.mubr.msk.f32.mxu1 %vm173_vm3, %v3627_v7 }
0x11d1   :  { %v3628_v10 = vadd.f32 %v4073_v1, %v3620_v9 }
0x11d3   :  { %4535 = vmatmul.mubr.msk.f32.vlgmr.msra.gmra.mrb[46].mxu1 %vm173_vm3, %v3628_v10 }
0x12a6   :  { %v4536_v48 = vpop.f32.mrb[46].mxu1 }
0x12a7   :  { %v3720_v19 = vadd.f32 %v4536_v48, %v4079_v44  ;;  %v3714_v60 = vpop.f32.mrb[47].mxu1 }
0x12a8   :  { %v3715_v61 = vadd.f32 %v4079_v44, %v3714_v60 }
0x12a9   :  { %v3724_v21 = vmax.f32 %v3720_v19, 0.0 }
0x12aa   :  { %v3723_v20 = vmax.f32 %v3715_v61, 0.0 }
0x12ac   :  { %4569 = vmatprep.mubr.f32.mxu0 %v3723_v20 }
0x12ad   :  { %4570 = vmatmul.mubr.f32.vlgmr.msra.gmra.mrb[32].mxu0 %v3724_v21 }
0x1380   :  { %v4571_v23 = vpop.f32.mrb[32].mxu0 }
0x1381   :  { %v3818_v27 = vadd.f32 %v4571_v23, %v5573_v15  ;;  %v3808_v28 = vpop.f32.mrb[33].mxu0  ;;  %v3877_v15 = vld [vmem:[%s5721_s16] sm:$0xff] }
0x1382   :  { %v3817_v29 = vadd.f32 %v3808_v28, %v5575_v18  ;;  %v3878_v18 = vld [vmem:[%s5721_s16 + $0x8] sm:$0xff] }
0x1383   :  { %v3828_v22 = vadd.f32 %v4099_v25, %v3818_v27  ;;  %v4711_v36 = vpack.c.bf16 %v3878_v18, %v3877_v15 }
0x1384   :  { %v3827_v30 = vadd.f32 %v4099_v25, %v3817_v29 }
0x1385   :  { %v3834_v31 = vsel %vm173_vm3, %v3828_v22, 0.0  ;;  %v3840_v32 = vmul.f32 %v3828_v22, %v3828_v22  ;;  %4712 = vmatprep.subr.bf16.mxu1 %v4711_v36 }
0x1386   :  { %3835 = vadd.xlane.f32.xlu0 %v3834_v31  ;;  %v3831_v16 = vsel %vm173_vm3, %v3827_v30, 0.0  ;;  %v3839_v17 = vmul.f32 %v3827_v30, %v3827_v30  ;;  %4714 = vmatpush3.bf16.msra.mxu1 %v4711_v36 }
0x1387   :  { %3832 = vadd.xlane.f32.xlu1 %v3831_v16  ;;  %v3844_v33 = vsel %vm173_vm3, %v3840_v32, 0.0  ;;  %4716 = vmatprep.subr.bf16.mxu1 %v4715_v38 }
0x1388   :  { %v3841_v34 = vsel %vm173_vm3, %v3839_v17, 0.0 }
0x138a   :  { %3845 = vadd.xlane.f32.xlu0 %v3844_v33  ;;  %4718 = vmatpush3.bf16.msra.mxu1 %v4715_v38 }
0x138b   :  { %3842 = vadd.xlane.f32.xlu1 %v3841_v34 }
0x1413   :  { %v3836_v39 = vpop.xlane.xlu0 %3835 }
0x1414   :  { %v3838_v40 = vmul.f32 0.03125, %v3836_v39  ;;  %v3833_v41 = vpop.xlane.xlu1 %3832 }
0x1415   :  { %v3837_v42 = vmul.f32 0.03125, %v3833_v41 }
0x1416   :  { %v3850_v45 = vmul.f32 %v3838_v40, %v3838_v40  ;;  %v3854_v52 = vsub.f32 %v3828_v22, %v3838_v40 }
0x1417   :  { %v3846_v43 = vpop.xlane.xlu0 %3845  ;;  %v3849_v47 = vmul.f32 %v3837_v42, %v3837_v42  ;;  %v3853_v54 = vsub.f32 %v3827_v30, %v3837_v42 }
0x1418   :  { %v3848_v11 = vmul.f32 0.03125, %v3846_v43  ;;  %v3843_v46 = vpop.xlane.xlu1 %3842 }
0x1419   :  { %v3847_v49 = vmul.f32 0.03125, %v3843_v46 }
0x141a   :  { %v3852_v50 = vsub.f32 %v3848_v11, %v3850_v45 }
0x141b   :  { %v3851_v24 = vsub.f32 %v3847_v49, %v3849_v47 }
0x141c   :  { %v3856_v26 = vadd.f32 1e-05, %v3852_v50 }
0x141d   :  { %v3855_v51 = vadd.f32 1e-05, %v3851_v24 }
0x141e   :  { %4814 = vrsqrt.f32 %v3856_v26 }
0x141f   :  { %4816 = vrsqrt.f32 %v3855_v51 }
0x1428   :  { %v4815_v53 = vpop.eup %4814 }
0x1429   :  { %v4817_v56 = vpop.eup %4816  ;;  %v3860_v57 = vmul.f32 %v4815_v53, %v3854_v52 }
0x142a   :  { %v3859_v58 = vmul.f32 %v4817_v56, %v3853_v54 }
0x142b   :  { %v3868_v62 = vmul.f32 %v4100_v55, %v3860_v57 }
0x142c   :  { %v3867_v63 = vmul.f32 %v4100_v55, %v3859_v58 }
0x142d   :  { %v3876_v6 = vadd.f32 %v4101_v59, %v3868_v62 }
0x142e   :  { %v3875_v0 = vadd.f32 %v4101_v59, %v3867_v63 }
0x1430   :  { %4580 = vmatprep.mubr.msk.f32.mxu1 %vm173_vm3, %v3875_v0 }
0x1431   :  { %4581 = vmatmul.mubr.msk.f32.vlgmr.msra.gmra.mrb[48].mxu1 %vm173_vm3, %v3876_v6 }
0x1504   :  { %v4582_v1 = vpop.f32.mrb[48].mxu1 }
0x1505   :  { %v3966_v2 = vadd.f32 %v4582_v1, %v4102_v8  ;;  %v3960_v3 = vpop.f32.mrb[49].mxu1 }
0x1506   :  { %v3961_v4 = vadd.f32 %v4102_v8, %v3960_v3 }
0x1507   :  { %3970 = vst [vmem:[#allocation2 + $0x8] sm:$0xff] %v3966_v2 }
0x1508   :  { %3969 = vst [vmem:[#allocation2] sm:$0xff] %v3961_v4 }
0x1509   :  { %4829 = shalt.err (!%p4826_p4)
}
0x150a   :  { %s4830_s17 = scalar_lea.hbm %s5723_s18, 256 }
0x150b   :  { %p4831_p5 = scmp.ne.s32.totalorder %s5723_s18, %s4830_s17  ;;  %p4834_p6 = scmp.lt.u32.totalorder %s4830_s17, %s5723_s18 }
0x150d   :  { %p4836_p7 = pnand %p4834_p6, %p4831_p5 }
0x150f   :  { %4839 = shalt.err (!%p4836_p7)
}
0x1510   :  { %s4855_s22 = smov 128  }
0x1511   :  { %3982 = dma.vmem_to_hbm [thread:$0]  %s3977_s27, 256, %s5723_s18, [#allocation3], %s4855_s22, %s4855_s22, %s4851_s29  }
0x1512   :  { %4840 = dma.done.wait [#allocation3], 256  }
0x1513   :  { %4841 = vsyncadd [#allocation3], 4294967040 }
0x1514   :  { %3986 = vsyncpa [#allocation3], 1 }

</bundles_post_ra>
